<compile_context>
chip_gen: v5e
topology: v5e:2x2
jax: 0.10.0
libtpu: 0.0.40
codegen_flags: <defaults>
</compile_context>

<pallas_src>
import jax
import jax.numpy as jnp
from jax.experimental import pallas as pl
from jax.experimental.pallas import tpu as pltpu

LANE = 128


def _round_up(v, m):
    return ((v + m - 1) // m) * m


def _pad2(a, rows, cols):
    """Zero-pad a 2-D array up to (rows, cols)."""
    out = jnp.zeros((rows, cols), a.dtype)
    return out.at[: a.shape[0], : a.shape[1]].set(a)


# ---------------------------------------------------------------------------
# Fused Pallas kernel: 3x CustomLayer(+tanh) + output Linear
# ---------------------------------------------------------------------------
def _gnn_fused_kernel(x_ref, a_ref, sd_ref,
                      wex0_ref, wed0_ref, wx0_ref,
                      wex1_ref, wed1_ref, wx1_ref,
                      wex2_ref, wed2_ref, wx2_ref,
                      wout_ref, bout_ref,
                      o_ref):
    """
    x_ref    : [NP, FP]  node features (zero-padded)
    a_ref    : [NP, NP]  A[i, j] = #edges j -> i  (== scatter @ gather)
    sd_ref   : [NP, 1]   per-node sum of incoming edge distances (== scatter @ dist)
    wex*_ref : [FP|HP, HP]  edge_mlp weight, feature part
    wed*_ref : [1, HP]      edge_mlp weight, distance part
    wx*_ref  : [FP|HP, HP]  lin_x weight (no bias)
    wout_ref : [HP, OP]     output Linear weight
    bout_ref : [1, OP]      output Linear bias
    o_ref    : [NP, OP]     per-node logits (padded)
    """
    a = a_ref[...]
    sd = sd_ref[...]
    h = x_ref[...]

    for wex_r, wed_r, wx_r in ((wex0_ref, wed0_ref, wx0_ref),
                               (wex1_ref, wed1_ref, wx1_ref),
                               (wex2_ref, wed2_ref, wx2_ref)):
        # scatter_add over edges, reassociated: A @ (h @ We_x)   (MXU)
        hw = jnp.dot(h, wex_r[...], preferred_element_type=jnp.float32)      # [NP, HP]
        agg = jnp.dot(a, hw, preferred_element_type=jnp.float32)             # [NP, HP]
        # distance term: broadcast multiply on the VPU (was a wasteful K=1 MXU matmul)
        agg = agg + sd * wed_r[...]                                          # [NP, HP]
        # + lin_x(h), then the tanh Gnn.forward applies after each layer
        h = jnp.tanh(agg + jnp.dot(h, wx_r[...],
                                   preferred_element_type=jnp.float32))      # [NP, HP]
        # dropout after the initial layer is identity in eval mode

    o_ref[...] = (jnp.dot(h, wout_ref[...], preferred_element_type=jnp.float32)
                  + bout_ref[...])                                           # [NP, OP]


# ---------------------------------------------------------------------------
# Wrapper
# ---------------------------------------------------------------------------
def gnn_forward(params, x, edge_index, edge_attr):
    """Full Gnn.forward (edge_attr branch, eval mode) in one pallas_call."""
    n, f = x.shape
    h = params["initial_layer"]["w_x"].shape[1]
    o = params["out"]["w"].shape[1]
    np_ = _round_up(n, LANE)
    fp = _round_up(f, LANE)
    hp = _round_up(h, LANE)
    op = _round_up(o, LANE)

    src, dst = edge_index[0], edge_index[1]
    edge_attr = edge_attr.astype(jnp.float32)

    # Collapse gather/scatter-add into graph-level constants (exact by linearity):
    #   A[i, j]   = number of edges with dst=i, src=j
    #   s_dist[i] = sum of distances of edges with dst=i
    adj = jnp.zeros((np_, np_), jnp.float32).at[dst, src].add(1.0)
    s_dist = jnp.zeros((np_, 1), jnp.float32).at[dst, 0].add(edge_attr)

    x_p = _pad2(x.astype(jnp.float32), np_, fp)

    def pad_layer(p, fin_p):
        return (_pad2(p["we_x"], fin_p, hp),
                _pad2(p["we_d"], 1, hp),
                _pad2(p["w_x"], fin_p, hp))

    l0 = pad_layer(params["initial_layer"], fp)
    l1 = pad_layer(params["layer1"], hp)
    l2 = pad_layer(params["layer2"], hp)
    w_out = _pad2(params["out"]["w"], hp, op)
    b_out = _pad2(params["out"]["b"], 1, op)

    n_in = 3 + 3 * 3 + 2
    out_p = pl.pallas_call(
        _gnn_fused_kernel,
        out_shape=jax.ShapeDtypeStruct((np_, op), jnp.float32),
        in_specs=[pl.BlockSpec(memory_space=pltpu.MemorySpace.VMEM)] * n_in,
        out_specs=pl.BlockSpec(memory_space=pltpu.MemorySpace.VMEM),
    )(x_p, adj, s_dist, *l0, *l1, *l2, w_out, b_out)

    return out_p[:n, :o]


# ---------------------------------------------------------------------------
# Deterministic parameter init (shapes from the module __init__)
# ---------------------------------------------------------------------------
def init_params(key, input_dim, hidden_dim, output_dim):
    def layer(key, fin, fout):
        k1, k2 = jax.random.split(key)
        scale_e = 1.0 / jnp.sqrt(fin + 1.0)
        we = jax.random.uniform(k1, (fin + 1, fout), jnp.float32, -scale_e, scale_e)
        scale_x = 1.0 / jnp.sqrt(float(fin))
        wx = jax.random.uniform(k2, (fin, fout), jnp.float32, -scale_x, scale_x)
        return {"we_x": we[:fin], "we_d": we[fin:fin + 1], "w_x": wx}

    k0, k1, k2, k3 = jax.random.split(key, 4)
    params = {
        "initial_layer": layer(k0, input_dim, hidden_dim),
        "layer1": layer(k1, hidden_dim, hidden_dim),
        "layer2": layer(k2, hidden_dim, hidden_dim),
    }
    ka, kb = jax.random.split(k3)
    s = 1.0 / jnp.sqrt(float(hidden_dim))
    params["out"] = {
        "w": jax.random.uniform(ka, (hidden_dim, output_dim), jnp.float32, -s, s),
        "b": jax.random.uniform(kb, (1, output_dim), jnp.float32, -s, s),
    }
    return params


# ---------------------------------------------------------------------------
# Pure-JAX reference (unfused, per-edge formulation) for a sanity check
# ---------------------------------------------------------------------------
def gnn_forward_ref(params, x, edge_index, edge_attr):
    src, dst = edge_index[0], edge_index[1]
    h = x.astype(jnp.float32)
    for name in ("initial_layer", "layer1", "layer2"):
        p = params[name]
        x_j = h[src]                                               # [E, F]
        msg = x_j @ p["we_x"] + edge_attr[:, None] @ p["we_d"]     # [E, H]
        agg = jnp.zeros((h.shape[0], msg.shape[1]), jnp.float32).at[dst].add(msg)
        h = jnp.tanh(agg + h @ p["w_x"])
    return h @ params["out"]["w"] + params["out"]["b"]


# ---------------------------------------------------------------------------
if __name__ == "__main__":
    INPUT_DIM, HIDDEN_DIM, OUTPUT_DIM = 4, 32, 8
    N_NODES, N_EDGES = 32, 64

    key = jax.random.PRNGKey(0)
    kp, kx, ke, kd = jax.random.split(key, 4)

    params = init_params(kp, INPUT_DIM, HIDDEN_DIM, OUTPUT_DIM)
    x = jax.random.normal(kx, (N_NODES, INPUT_DIM), jnp.float32)
    edge_index = jax.random.randint(ke, (2, N_EDGES), 0, N_NODES, jnp.int32)
    edge_attr = jax.random.uniform(kd, (N_EDGES,), jnp.float32)    # distances

    out = gnn_forward(params, x, edge_index, edge_attr)
    out = jax.block_until_ready(out)

    ref = gnn_forward_ref(params, x, edge_index, edge_attr)
    assert out.shape == (N_NODES, OUTPUT_DIM)
    assert jnp.allclose(out, ref, atol=1e-3, rtol=1e-3)

    print("KERNEL_OK")
</pallas_src>

<mosaic_0001>
module attributes {stable_mosaic.version = 11 : i64} {
  func.func @_gnn_fused_kernel(%arg0: memref<128x128xf32, #tpu.memory_space<vmem>>, %arg1: memref<128x128xf32, #tpu.memory_space<vmem>>, %arg2: memref<128x1xf32, #tpu.memory_space<vmem>>, %arg3: memref<128x128xf32, #tpu.memory_space<vmem>>, %arg4: memref<1x128xf32, #tpu.memory_space<vmem>>, %arg5: memref<128x128xf32, #tpu.memory_space<vmem>>, %arg6: memref<128x128xf32, #tpu.memory_space<vmem>>, %arg7: memref<1x128xf32, #tpu.memory_space<vmem>>, %arg8: memref<128x128xf32, #tpu.memory_space<vmem>>, %arg9: memref<128x128xf32, #tpu.memory_space<vmem>>, %arg10: memref<1x128xf32, #tpu.memory_space<vmem>>, %arg11: memref<128x128xf32, #tpu.memory_space<vmem>>, %arg12: memref<128x128xf32, #tpu.memory_space<vmem>>, %arg13: memref<1x128xf32, #tpu.memory_space<vmem>>, %arg14: memref<128x128xf32, #tpu.memory_space<vmem>>) attributes {dimension_semantics = [], scalar_prefetch = 0 : i64, scratch_operands = 0 : i64, tpu.core_type = #tpu.core_type<tc>} {
    %c0 = arith.constant 0 : index
    %c0_0 = arith.constant 0 : index
    %0 = vector.load %arg1[%c0, %c0_0] : memref<128x128xf32, #tpu.memory_space<vmem>>, vector<128x128xf32>
    %c0_1 = arith.constant 0 : index
    %c0_2 = arith.constant 0 : index
    %1 = vector.load %arg2[%c0_1, %c0_2] : memref<128x1xf32, #tpu.memory_space<vmem>>, vector<128x1xf32>
    %c0_3 = arith.constant 0 : index
    %c0_4 = arith.constant 0 : index
    %2 = vector.load %arg0[%c0_3, %c0_4] : memref<128x128xf32, #tpu.memory_space<vmem>>, vector<128x128xf32>
    %c0_5 = arith.constant 0 : index
    %c0_6 = arith.constant 0 : index
    %3 = vector.load %arg3[%c0_5, %c0_6] : memref<128x128xf32, #tpu.memory_space<vmem>>, vector<128x128xf32>
    %cst = arith.constant dense<0.000000e+00> : vector<128x128xf32>
    %4 = tpu.matmul %2, %3, %cst {dimension_numbers = #tpu.dot_dimension_numbers<[1], [0], [0], [1], [0, 0, 1, 1], [], []>} : vector<128x128xf32>, vector<128x128xf32>, vector<128x128xf32> -> vector<128x128xf32>
    %cst_7 = arith.constant dense<0.000000e+00> : vector<128x128xf32>
    %5 = tpu.matmul %0, %4, %cst_7 {dimension_numbers = #tpu.dot_dimension_numbers<[1], [0], [0], [1], [0, 0, 1, 1], [], []>} : vector<128x128xf32>, vector<128x128xf32>, vector<128x128xf32> -> vector<128x128xf32>
    %c0_8 = arith.constant 0 : index
    %c0_9 = arith.constant 0 : index
    %6 = vector.load %arg4[%c0_8, %c0_9] : memref<1x128xf32, #tpu.memory_space<vmem>>, vector<1x128xf32>
    %7 = vector.broadcast %1 : vector<128x1xf32> to vector<128x128xf32>
    %8 = vector.broadcast %6 : vector<1x128xf32> to vector<128x128xf32>
    %9 = arith.mulf %7, %8 : vector<128x128xf32>
    %10 = arith.addf %5, %9 : vector<128x128xf32>
    %c0_10 = arith.constant 0 : index
    %c0_11 = arith.constant 0 : index
    %11 = vector.load %arg5[%c0_10, %c0_11] : memref<128x128xf32, #tpu.memory_space<vmem>>, vector<128x128xf32>
    %cst_12 = arith.constant dense<0.000000e+00> : vector<128x128xf32>
    %12 = tpu.matmul %2, %11, %cst_12 {dimension_numbers = #tpu.dot_dimension_numbers<[1], [0], [0], [1], [0, 0, 1, 1], [], []>} : vector<128x128xf32>, vector<128x128xf32>, vector<128x128xf32> -> vector<128x128xf32>
    %13 = arith.addf %10, %12 : vector<128x128xf32>
    %14 = math.tanh %13 : vector<128x128xf32>
    %c0_13 = arith.constant 0 : index
    %c0_14 = arith.constant 0 : index
    %15 = vector.load %arg6[%c0_13, %c0_14] : memref<128x128xf32, #tpu.memory_space<vmem>>, vector<128x128xf32>
    %cst_15 = arith.constant dense<0.000000e+00> : vector<128x128xf32>
    %16 = tpu.matmul %14, %15, %cst_15 {dimension_numbers = #tpu.dot_dimension_numbers<[1], [0], [0], [1], [0, 0, 1, 1], [], []>} : vector<128x128xf32>, vector<128x128xf32>, vector<128x128xf32> -> vector<128x128xf32>
    %cst_16 = arith.constant dense<0.000000e+00> : vector<128x128xf32>
    %17 = tpu.matmul %0, %16, %cst_16 {dimension_numbers = #tpu.dot_dimension_numbers<[1], [0], [0], [1], [0, 0, 1, 1], [], []>} : vector<128x128xf32>, vector<128x128xf32>, vector<128x128xf32> -> vector<128x128xf32>
    %c0_17 = arith.constant 0 : index
    %c0_18 = arith.constant 0 : index
    %18 = vector.load %arg7[%c0_17, %c0_18] : memref<1x128xf32, #tpu.memory_space<vmem>>, vector<1x128xf32>
    %19 = vector.broadcast %1 : vector<128x1xf32> to vector<128x128xf32>
    %20 = vector.broadcast %18 : vector<1x128xf32> to vector<128x128xf32>
    %21 = arith.mulf %19, %20 : vector<128x128xf32>
    %22 = arith.addf %17, %21 : vector<128x128xf32>
    %c0_19 = arith.constant 0 : index
    %c0_20 = arith.constant 0 : index
    %23 = vector.load %arg8[%c0_19, %c0_20] : memref<128x128xf32, #tpu.memory_space<vmem>>, vector<128x128xf32>
    %cst_21 = arith.constant dense<0.000000e+00> : vector<128x128xf32>
    %24 = tpu.matmul %14, %23, %cst_21 {dimension_numbers = #tpu.dot_dimension_numbers<[1], [0], [0], [1], [0, 0, 1, 1], [], []>} : vector<128x128xf32>, vector<128x128xf32>, vector<128x128xf32> -> vector<128x128xf32>
    %25 = arith.addf %22, %24 : vector<128x128xf32>
    %26 = math.tanh %25 : vector<128x128xf32>
    %c0_22 = arith.constant 0 : index
    %c0_23 = arith.constant 0 : index
    %27 = vector.load %arg9[%c0_22, %c0_23] : memref<128x128xf32, #tpu.memory_space<vmem>>, vector<128x128xf32>
    %cst_24 = arith.constant dense<0.000000e+00> : vector<128x128xf32>
    %28 = tpu.matmul %26, %27, %cst_24 {dimension_numbers = #tpu.dot_dimension_numbers<[1], [0], [0], [1], [0, 0, 1, 1], [], []>} : vector<128x128xf32>, vector<128x128xf32>, vector<128x128xf32> -> vector<128x128xf32>
    %cst_25 = arith.constant dense<0.000000e+00> : vector<128x128xf32>
    %29 = tpu.matmul %0, %28, %cst_25 {dimension_numbers = #tpu.dot_dimension_numbers<[1], [0], [0], [1], [0, 0, 1, 1], [], []>} : vector<128x128xf32>, vector<128x128xf32>, vector<128x128xf32> -> vector<128x128xf32>
    %c0_26 = arith.constant 0 : index
    %c0_27 = arith.constant 0 : index
    %30 = vector.load %arg10[%c0_26, %c0_27] : memref<1x128xf32, #tpu.memory_space<vmem>>, vector<1x128xf32>
    %31 = vector.broadcast %1 : vector<128x1xf32> to vector<128x128xf32>
    %32 = vector.broadcast %30 : vector<1x128xf32> to vector<128x128xf32>
    %33 = arith.mulf %31, %32 : vector<128x128xf32>
    %34 = arith.addf %29, %33 : vector<128x128xf32>
    %c0_28 = arith.constant 0 : index
    %c0_29 = arith.constant 0 : index
    %35 = vector.load %arg11[%c0_28, %c0_29] : memref<128x128xf32, #tpu.memory_space<vmem>>, vector<128x128xf32>
    %cst_30 = arith.constant dense<0.000000e+00> : vector<128x128xf32>
    %36 = tpu.matmul %26, %35, %cst_30 {dimension_numbers = #tpu.dot_dimension_numbers<[1], [0], [0], [1], [0, 0, 1, 1], [], []>} : vector<128x128xf32>, vector<128x128xf32>, vector<128x128xf32> -> vector<128x128xf32>
    %37 = arith.addf %34, %36 : vector<128x128xf32>
    %38 = math.tanh %37 : vector<128x128xf32>
    %c0_31 = arith.constant 0 : index
    %c0_32 = arith.constant 0 : index
    %39 = vector.load %arg12[%c0_31, %c0_32] : memref<128x128xf32, #tpu.memory_space<vmem>>, vector<128x128xf32>
    %cst_33 = arith.constant dense<0.000000e+00> : vector<128x128xf32>
    %40 = tpu.matmul %38, %39, %cst_33 {dimension_numbers = #tpu.dot_dimension_numbers<[1], [0], [0], [1], [0, 0, 1, 1], [], []>} : vector<128x128xf32>, vector<128x128xf32>, vector<128x128xf32> -> vector<128x128xf32>
    %c0_34 = arith.constant 0 : index
    %c0_35 = arith.constant 0 : index
    %41 = vector.load %arg13[%c0_34, %c0_35] : memref<1x128xf32, #tpu.memory_space<vmem>>, vector<1x128xf32>
    %42 = vector.broadcast %41 : vector<1x128xf32> to vector<128x128xf32>
    %43 = arith.addf %40, %42 : vector<128x128xf32>
    %c0_36 = arith.constant 0 : index
    %c0_37 = arith.constant 0 : index
    %44 = vector.load %arg14[%c0_36, %c0_37] : memref<128x128xf32, #tpu.memory_space<vmem>>, vector<128x128xf32>
    tpu.vector_store %arg14[%c0_36, %c0_37], %43 {strides = array<i32>} : memref<128x128xf32, #tpu.memory_space<vmem>>, vector<128x128xf32>,
    return
  }
}

</mosaic_0001>

<bundles_post_ra>
// kernel: tpu_custom_call.1
= control target key start
LH: loop header
LB: loop body
LE: loop exit
PB: predicated region body
PF: predicated region fallthrough
CT: control target
= control target key end

     0   :  { %19 = vsyncpa [#allocation3], 0  ;;  %s2158_s0 = inlined_call_operand.vmem [shape: f32[128,128], index: 0, kind: input, shape index: {}]   ;;  %s2159_s1 = inlined_call_operand.hbm [shape: f32[128,128], index: 1, kind: input, shape index: {}]   ;;  %s2160_s2 = inlined_call_operand.vmem [shape: f32[128,1], index: 2, kind: input, shape index: {}]   ;;  %s2161_s3 = inlined_call_operand.hbm [shape: f32[128,128], index: 3, kind: input, shape index: {}]   ;;  %s2162_s4 = inlined_call_operand.vmem [shape: f32[1,128], index: 4, kind: input, shape index: {}]   ;;  %s2163_s5 = inlined_call_operand.hbm [shape: f32[128,128], index: 5, kind: input, shape index: {}]   ;;  %s2164_s6 = inlined_call_operand.hbm [shape: f32[128,128], index: 6, kind: input, shape index: {}]   ;;  %s2165_s7 = inlined_call_operand.vmem [shape: f32[1,128], index: 7, kind: input, shape index: {}]   ;;  %s2166_s8 = inlined_call_operand.hbm [shape: f32[128,128], index: 8, kind: input, shape index: {}]   ;;  %s2167_s9 = inlined_call_operand.hbm [shape: f32[128,128], index: 9, kind: input, shape index: {}]   ;;  %s2168_s10 = inlined_call_operand.vmem [shape: f32[1,128], index: 10, kind: input, shape index: {}]   ;;  %s2169_s11 = inlined_call_operand.hbm [shape: f32[128,128], index: 11, kind: input, shape index: {}]   ;;  %s2170_s12 = inlined_call_operand.hbm [shape: f32[128,128], index: 12, kind: input, shape index: {}]   ;;  %s2171_s13 = inlined_call_operand.vmem [shape: f32[1,128], index: 13, kind: input, shape index: {}]   ;;  %s2172_s14 = inlined_call_operand.hbm [shape: f32[128,128], index: 14, kind: output, shape index: {}]  }
   0x1   :  { %20 = vsyncpa [#allocation6], 0 }
   0x2   :  { %21 = vsyncpa [#allocation9], 0 }
   0x3   :  { %22 = vsyncpa [#allocation12], 0 }
   0x4   :  { %23 = vsyncpa [#allocation15], 0 }
   0x5   :  { %24 = vsyncpa [#allocation4], 0  ;;  %s46_s15 = sshll.u32 %s2161_s3, 4  ;;  %s1654_s16 = smov [#allocation5]   ;;  %s47_s15 = int_to_ptr.hbm [resolvable:$true] %s46_s15 }
   0x6   :  { %s48_s17 = sshll.u32 %s1654_s16, 4  ;;  %s74_s20 = sshll.u32 %s2164_s6, 4  ;;  %s49_s17 = int_to_ptr.vmem [resolvable:$true] %s48_s17  ;;  %s75_s20 = int_to_ptr.hbm [resolvable:$true] %s74_s20 }
   0x7   :  { %s1655_s21 = smov 128   ;;  %s1656_s22 = smov 8  }
   0x8   :  { %54 = dma.hbm_to_vmem [thread:$0]  %s47_s15, 2048, %s49_s17, [#allocation6], %s1655_s21, %s1655_s21, %s1656_s22  }
   0x9   :  { %s1657_s23 = smov [#allocation8]   ;;  %s102_s3 = sshll.u32 %s2167_s9, 4  ;;  %s103_s3 = int_to_ptr.hbm [resolvable:$true] %s102_s3 }
   0xa   :  { %s76_s24 = sshll.u32 %s1657_s23, 4  ;;  %s31_s28 = sshll.u32 %s2159_s1, 4  ;;  %s77_s24 = int_to_ptr.vmem [resolvable:$true] %s76_s24  ;;  %s32_s28 = int_to_ptr.hbm [resolvable:$true] %s31_s28 }
   0xb   :  { %82 = dma.hbm_to_vmem [thread:$0]  %s75_s20, 2048, %s77_s24, [#allocation9], %s1655_s21, %s1655_s21, %s1656_s22  }
   0xc   :  { %s1658_s29 = smov [#allocation11]   ;;  %s1659_s15 = smov [#allocation2]  }
   0xd   :  { %s104_s30 = sshll.u32 %s1658_s29, 4  ;;  %s33_s9 = sshll.u32 %s1659_s15, 4  ;;  %s105_s30 = int_to_ptr.vmem [resolvable:$true] %s104_s30  ;;  %s34_s9 = int_to_ptr.vmem [resolvable:$true] %s33_s9 }
   0xe   :  { %110 = dma.hbm_to_vmem [thread:$0]  %s103_s3, 2048, %s105_s30, [#allocation12], %s1655_s21, %s1655_s21, %s1656_s22  }
   0xf   :  { %s61_s18 = sshll.u32 %s2163_s5, 4  ;;  %s89_s20 = sshll.u32 %s2166_s8, 4  ;;  %s62_s18 = int_to_ptr.hbm [resolvable:$true] %s61_s18  ;;  %s90_s20 = int_to_ptr.hbm [resolvable:$true] %s89_s20 }
  0x10   :  { %39 = dma.hbm_to_vmem [thread:$0]  %s32_s28, 2048, %s34_s9, [#allocation3], %s1655_s21, %s1655_s21, %s1656_s22  }
  0x11   :  { %s1660_s23 = smov [#allocation7]   ;;  %s1661_s25 = smov [#allocation10]  }
  0x12   :  { %s63_s24 = sshll.u32 %s1660_s23, 4  ;;  %s91_s5 = sshll.u32 %s1661_s25, 4  ;;  %s64_s24 = int_to_ptr.vmem [resolvable:$true] %s63_s24  ;;  %s92_s5 = int_to_ptr.vmem [resolvable:$true] %s91_s5 }
  0x13   :  { %69 = dma.hbm_to_vmem [thread:$0]  %s62_s18, 2048, %s64_s24, [#allocation6], %s1655_s21, %s1655_s21, %s1656_s22  }
  0x14   :  { %s117_s6 = sshll.u32 %s2169_s11, 4  ;;  %s130_s28 = sshll.u32 %s2170_s12, 4  ;;  %s118_s6 = int_to_ptr.hbm [resolvable:$true] %s117_s6  ;;  %s131_s28 = int_to_ptr.hbm [resolvable:$true] %s130_s28 }
  0x15   :  { %97 = dma.hbm_to_vmem [thread:$0]  %s90_s20, 2048, %s92_s5, [#allocation9], %s1655_s21, %s1655_s21, %s1656_s22  }
  0x16   :  { %s1662_s29 = smov [#allocation13]   ;;  %s1663_s15 = smov [#allocation14]  }
  0x17   :  { %s119_s30 = sshll.u32 %s1662_s29, 4  ;;  %s132_s11 = sshll.u32 %s1663_s15, 4  ;;  %s120_s30 = int_to_ptr.vmem [resolvable:$true] %s119_s30  ;;  %s133_s11 = int_to_ptr.vmem [resolvable:$true] %s132_s11 }
  0x18   :  { %125 = dma.hbm_to_vmem [thread:$0]  %s118_s6, 2048, %s120_s30, [#allocation12], %s1655_s21, %s1655_s21, %s1656_s22  }
  0x19   :  { %138 = dma.hbm_to_vmem [thread:$0]  %s131_s28, 2048, %s133_s11, [#allocation15], %s1655_s21, %s1655_s21, %s1656_s22  }
  0x1a   :  { %1642 = dma.done.wait [#allocation3], 2048  }
  0x1b   :  { %1643 = vsyncadd [#allocation3], 4294965248 }
  0x1c   :  { %1644 = dma.done.wait [#allocation6], 4096  }
  0x1d   :  { %1645 = vsyncadd [#allocation6], 4294963200 }
  0x1e   :  { %1646 = dma.done.wait [#allocation9], 4096  }
  0x1f   :  { %1647 = vsyncadd [#allocation9], 4294963200 }
  0x20   :  { %1648 = dma.done.wait [#allocation12], 4096  }
  0x21   :  { %1649 = vsyncadd [#allocation12], 4294963200 }
  0x22   :  { %1650 = dma.done.wait [#allocation15], 2048  }
  0x23   :  { %1651 = vsyncadd [#allocation15], 4294965248  ;;  %v236_v0 = vld [vmem:[#allocation5 + $0x78] sm:$0xff]  ;;  %v235_v1 = vld [vmem:[#allocation5 + $0x70] sm:$0xff]  ;;  %v1664_v53 = vmov 0   ;;  %s1245_s1 = sshll.u32 %s2172_s14, 4  ;;  %s1246_s1 = int_to_ptr.hbm [resolvable:$true] %s1245_s1 }
  0x24   :  { %1262 = vmatpush.msra.mxu2 %v236_v0  ;;  %237 = vmatpush.msra.mxu0 %v236_v0  ;;  %v234_v2 = vld [vmem:[#allocation5 + $0x68] sm:$0xff]  ;;  %v233_v3 = vld [vmem:[#allocation5 + $0x60] sm:$0xff]  ;;  %v232_v4 = vld [vmem:[#allocation5 + $0x58] sm:$0xff] }
  0x25   :  { %v231_v5 = vld [vmem:[#allocation5 + $0x50] sm:$0xff]  ;;  %v230_v6 = vld [vmem:[#allocation5 + $0x48] sm:$0xff]  ;;  %v229_v7 = vld [vmem:[#allocation5 + $0x40] sm:$0xff]  ;;  %1306 = vset.pattern.permute.xlu0 %v1664_v53  ;;  %1307 = vset.pattern.permute.xlu1 %v1664_v53 }
  0x26   :  { %1263 = vmatpush.msra.mxu2 %v235_v1  ;;  %238 = vmatpush.msra.mxu0 %v235_v1  ;;  %v228_v8 = vld [vmem:[#allocation5 + $0x38] sm:$0xff]  ;;  %v227_v9 = vld [vmem:[#allocation5 + $0x30] sm:$0xff]  ;;  %v226_v10 = vld [vmem:[#allocation5 + $0x28] sm:$0xff] }
  0x27   :  { %v225_v11 = vld [vmem:[#allocation5 + $0x20] sm:$0xff]  ;;  %v224_v12 = vld [vmem:[#allocation5 + $0x18] sm:$0xff]  ;;  %v223_v13 = vld [vmem:[#allocation5 + $0x10] sm:$0xff]  ;;  %1308 = vset.pattern.permute.xlu2 %v1664_v53 }
  0x28   :  { %1264 = vmatpush.msra.mxu2 %v234_v2  ;;  %239 = vmatpush.msra.mxu0 %v234_v2  ;;  %v222_v14 = vld [vmem:[#allocation5 + $0x8] sm:$0xff]  ;;  %v221_v15 = vld [vmem:[#allocation5] sm:$0xff]  ;;  %v1813_v20 = vld [vmem:[%s2158_s0 + $0x50] sm:$0xff] }
  0x29   :  { %v1792_v16 = vld [vmem:[%s2158_s0 + $0x40] sm:$0xff]  ;;  %v1804_v18 = vld [vmem:[%s2158_s0 + $0x48] sm:$0xff]  ;;  %v207_v21 = vld [vmem:[%s2158_s0 + $0x10] sm:$0xff] }
  0x2a   :  { %1265 = vmatpush.msra.mxu2 %v233_v3  ;;  %240 = vmatpush.msra.mxu0 %v233_v3  ;;  %v1797_v17 = vld [vmem:[%s2158_s0] sm:$0xff]  ;;  %v206_v19 = vld [vmem:[%s2158_s0 + $0x8] sm:$0xff]  ;;  %v1822_v22 = vld [vmem:[%s2158_s0 + $0x58] sm:$0xff] }
  0x2b   :  { %v208_v23 = vld [vmem:[%s2158_s0 + $0x18] sm:$0xff]  ;;  %v481_v25 = vld [vmem:[#allocation7 + $0x70] sm:$0xff]  ;;  %v480_v26 = vld [vmem:[#allocation7 + $0x68] sm:$0xff] }
  0x2c   :  { %1266 = vmatpush.msra.mxu2 %v232_v4  ;;  %241 = vmatpush.msra.mxu0 %v232_v4  ;;  %v482_v24 = vld [vmem:[#allocation7 + $0x78] sm:$0xff]  ;;  %v1831_v27 = vld [vmem:[%s2158_s0 + $0x60] sm:$0xff]  ;;  %v1840_v29 = vld [vmem:[%s2158_s0 + $0x68] sm:$0xff] }
  0x2d   :  { %v209_v28 = vld [vmem:[%s2158_s0 + $0x20] sm:$0xff]  ;;  %v210_v30 = vld [vmem:[%s2158_s0 + $0x28] sm:$0xff]  ;;  %v1849_v31 = vld [vmem:[%s2158_s0 + $0x70] sm:$0xff] }
  0x2e   :  { %1267 = vmatpush.msra.mxu2 %v231_v5  ;;  %242 = vmatpush.msra.mxu0 %v231_v5  ;;  %v211_v32 = vld [vmem:[%s2158_s0 + $0x30] sm:$0xff]  ;;  %v1858_v33 = vld [vmem:[%s2158_s0 + $0x78] sm:$0xff]  ;;  %v479_v35 = vld [vmem:[#allocation7 + $0x60] sm:$0xff] }
  0x2f   :  { %v212_v34 = vld [vmem:[%s2158_s0 + $0x38] sm:$0xff]  ;;  %v477_v37 = vld [vmem:[#allocation7 + $0x50] sm:$0xff]  ;;  %v476_v38 = vld [vmem:[#allocation7 + $0x48] sm:$0xff] }
  0x30   :  { %1268 = vmatpush.msra.mxu2 %v230_v6  ;;  %243 = vmatpush.msra.mxu0 %v230_v6  ;;  %v478_v36 = vld [vmem:[#allocation7 + $0x58] sm:$0xff]  ;;  %v475_v39 = vld [vmem:[#allocation7 + $0x40] sm:$0xff]  ;;  %v473_v41 = vld [vmem:[#allocation7 + $0x30] sm:$0xff] }
  0x31   :  { %v474_v40 = vld [vmem:[#allocation7 + $0x38] sm:$0xff]  ;;  %v472_v42 = vld [vmem:[#allocation7 + $0x28] sm:$0xff]  ;;  %v471_v43 = vld [vmem:[#allocation7 + $0x20] sm:$0xff] }
  0x32   :  { %1269 = vmatpush.msra.mxu2 %v229_v7  ;;  %244 = vmatpush.msra.mxu0 %v229_v7  ;;  %v470_v44 = vld [vmem:[#allocation7 + $0x18] sm:$0xff]  ;;  %v469_v45 = vld [vmem:[#allocation7 + $0x10] sm:$0xff]  ;;  %v468_v46 = vld [vmem:[#allocation7 + $0x8] sm:$0xff] }
  0x33   :  { %v467_v47 = vld [vmem:[#allocation7] sm:$0xff]  ;;  %v190_v59 = vld [vmem:[%s2160_s2 + $0x8] sm:$0xff]  ;;  %v195_v62 = vld [vmem:[%s2160_s2 + $0x30] sm:$0xff] }
  0x34   :  { %1270 = vmatpush.msra.mxu2 %v228_v8  ;;  %245 = vmatpush.msra.mxu0 %v228_v8  ;;  %v189_v56 = vld [vmem:[%s2160_s2] sm:$0xff]  ;;  %v191_v0 = vld [vmem:[%s2160_s2 + $0x10] sm:$0xff]  ;;  %v198_v1 = vld [vmem:[%s2160_s2 + $0x48] sm:$0xff] }
  0x35   :  { %305 = vperm.xlu0 %1306, %v189_v56   ;;  %315 = vperm.xlu1 %1307, %v191_v0   ;;  %v192_v4 = vld [vmem:[%s2160_s2 + $0x18] sm:$0xff]  ;;  %v201_v5 = vld [vmem:[%s2160_s2 + $0x60] sm:$0xff]  ;;  %v586_v53 = vld [vmem:[#allocation8 + $0x30] sm:$0xff] }
  0x36   :  { %1271 = vmatpush.msra.mxu2 %v227_v9  ;;  %246 = vmatpush.msra.mxu0 %v227_v9  ;;  %v196_v7 = vld [vmem:[%s2160_s2 + $0x38] sm:$0xff] }
  0x37   :  { %v204_v8 = vld [vmem:[%s2160_s2 + $0x78] sm:$0xff] }
  0x38   :  { %1272 = vmatpush.msra.mxu2 %v226_v10  ;;  %247 = vmatpush.msra.mxu0 %v226_v10  ;;  %v199_v10 = vld [vmem:[%s2160_s2 + $0x50] sm:$0xff] }
  0x3a   :  { %1273 = vmatpush.msra.mxu2 %v225_v11  ;;  %248 = vmatpush.msra.mxu0 %v225_v11  ;;  %v202_v11 = vld [vmem:[%s2160_s2 + $0x68] sm:$0xff] }
  0x3c   :  { %1274 = vmatpush.msra.mxu2 %v224_v12  ;;  %249 = vmatpush.msra.mxu0 %v224_v12  ;;  %v1912_v12 = vld [vmem:[#allocation2] sm:$0xff] }
  0x3d   :  { %310 = vperm.xlu0 %1306, %v190_v59   ;;  %320 = vperm.xlu1 %1307, %v192_v4   ;;  %v584_v4 = vld [vmem:[#allocation8 + $0x20] sm:$0xff] }
  0x3e   :  { %1275 = vmatpush.msra.mxu2 %v223_v13  ;;  %250 = vmatpush.msra.mxu0 %v223_v13  ;;  %v1914_v13 = vld [vmem:[#allocation2 + $0x40] sm:$0xff] }
  0x40   :  { %1276 = vmatpush.msra.mxu2 %v222_v14  ;;  %251 = vmatpush.msra.mxu0 %v222_v14  ;;  %v193_v14 = vld [vmem:[%s2160_s2 + $0x20] sm:$0xff] }
  0x41   :  { %325 = vperm.xlu2 %1308, %v193_v14   ;;  %v748_v14 = vld [vmem:[#allocation10 + $0x10] sm:$0xff] }
  0x42   :  { %1277 = vmatpush.msra.mxu2 %v221_v15  ;;  %252 = vmatpush.msra.mxu0 %v221_v15  ;;  %v1924_v15 = vld [vmem:[#allocation2 + $0x8] sm:$0xff] }
  0x43   :  { %277 = vmatmul.f32.vlgmr.msra.gmra.mxu2 %v1792_v16  ;;  %253 = vmatmul.f32.vlgmr.msra.gmra.mxu0 %v1797_v17 }
  0x44   :  { %483 = vmatpush.msrb.mxu2 %v482_v24  ;;  %v1954_v24 = vld [vmem:[#allocation2 + $0x20] sm:$0xff] }
  0x45   :  { %335 = vperm.xlu0 %1306, %v195_v62   ;;  %340 = vperm.xlu1 %1307, %v196_v7  }
  0x46   :  { %484 = vmatpush.msrb.mxu2 %v481_v25  ;;  %v1956_v25 = vld [vmem:[#allocation2 + $0x60] sm:$0xff] }
  0x48   :  { %485 = vmatpush.msrb.mxu2 %v480_v26  ;;  %v203_v26 = vld [vmem:[%s2160_s2 + $0x70] sm:$0xff] }
  0x4a   :  { %486 = vmatpush.msrb.mxu2 %v479_v35  ;;  %v593_v35 = vld [vmem:[#allocation8 + $0x68] sm:$0xff] }
  0x4b   :  { %280 = vmatmul.f32.gmra.mxu2 %v1804_v18  ;;  %256 = vmatmul.f32.gmra.mxu0 %v206_v19 }
  0x4c   :  { %487 = vmatpush.msrb.mxu2 %v478_v36  ;;  %v759_v36 = vld [vmem:[#allocation10 + $0x68] sm:$0xff] }
  0x4d   :  { %350 = vperm.xlu0 %1306, %v198_v1   ;;  %355 = vperm.xlu1 %1307, %v199_v10   ;;  %v585_v1 = vld [vmem:[#allocation8 + $0x28] sm:$0xff] }
  0x4e   :  { %488 = vmatpush.msrb.mxu2 %v477_v37  ;;  %v592_v37 = vld [vmem:[#allocation8 + $0x60] sm:$0xff] }
  0x50   :  { %489 = vmatpush.msrb.mxu2 %v476_v38  ;;  %v758_v38 = vld [vmem:[#allocation10 + $0x60] sm:$0xff] }
  0x52   :  { %490 = vmatpush.msrb.mxu2 %v475_v39  ;;  %v591_v39 = vld [vmem:[#allocation8 + $0x58] sm:$0xff] }
  0x53   :  { %283 = vmatmul.f32.gmra.mxu2 %v1813_v20  ;;  %259 = vmatmul.f32.gmra.mxu0 %v207_v21 }
  0x54   :  { %491 = vmatpush.msrb.mxu2 %v474_v40  ;;  %v757_v40 = vld [vmem:[#allocation10 + $0x58] sm:$0xff] }
  0x55   :  { %365 = vperm.xlu0 %1306, %v201_v5   ;;  %370 = vperm.xlu1 %1307, %v202_v11   ;;  %v750_v5 = vld [vmem:[#allocation10 + $0x20] sm:$0xff]  ;;  %v582_v11 = vld [vmem:[#allocation8 + $0x10] sm:$0xff] }
  0x56   :  { %492 = vmatpush.msrb.mxu2 %v473_v41 }
  0x58   :  { %493 = vmatpush.msrb.mxu2 %v472_v42  ;;  %v1977_v42 = vld [vmem:[#allocation2 + $0x38] sm:$0xff] }
  0x5a   :  { %494 = vmatpush.msrb.mxu2 %v471_v43  ;;  %v1979_v43 = vld [vmem:[#allocation2 + $0x78] sm:$0xff] }
  0x5b   :  { %286 = vmatmul.f32.gmra.mxu2 %v1822_v22  ;;  %262 = vmatmul.f32.gmra.mxu0 %v208_v23 }
  0x5c   :  { %495 = vmatpush.msrb.mxu2 %v470_v44  ;;  %v590_v44 = vld [vmem:[#allocation8 + $0x50] sm:$0xff] }
  0x5d   :  { %380 = vperm.xlu0 %1306, %v204_v8   ;;  %v583_v8 = vld [vmem:[#allocation8 + $0x18] sm:$0xff] }
  0x5e   :  { %496 = vmatpush.msrb.mxu2 %v469_v45  ;;  %v756_v45 = vld [vmem:[#allocation10 + $0x50] sm:$0xff] }
  0x60   :  { %497 = vmatpush.msrb.mxu2 %v468_v46  ;;  %v589_v46 = vld [vmem:[#allocation8 + $0x48] sm:$0xff] }
  0x62   :  { %498 = vmatpush.msrb.mxu2 %v467_v47  ;;  %v755_v47 = vld [vmem:[#allocation10 + $0x48] sm:$0xff] }
  0x63   :  { %289 = vmatmul.f32.gmra.mxu2 %v1831_v27  ;;  %265 = vmatmul.f32.gmra.mxu0 %v209_v28 }
  0x6b   :  { %292 = vmatmul.f32.gmra.mxu2 %v1840_v29  ;;  %268 = vmatmul.f32.gmra.mxu0 %v210_v30 }
  0x73   :  { %295 = vmatmul.f32.gmra.mxu2 %v1849_v31  ;;  %271 = vmatmul.f32.gmra.mxu0 %v211_v32 }
  0x7b   :  { %298 = vmatmul.f32.gmra.mxu2 %v1858_v33  ;;  %274 = vmatmul.f32.gmra.mxu0 %v212_v34 }
  0x83   :  { %499 = vmatmul.f32.vlgmr.msrb.gmra.mxu2 %v1797_v17  ;;  %v194_v17 = vld [vmem:[%s2160_s2 + $0x28] sm:$0xff] }
  0x84   :  { %330 = vperm.xlu2 %1308, %v194_v17  }
  0x8b   :  { %502 = vmatmul.f32.gmra.mxu2 %v206_v19  ;;  %v1936_v19 = vld [vmem:[#allocation2 + $0x50] sm:$0xff] }
  0x93   :  { %505 = vmatmul.f32.gmra.mxu2 %v207_v21  ;;  %v1944_v21 = vld [vmem:[#allocation2 + $0x18] sm:$0xff] }
  0x9b   :  { %508 = vmatmul.f32.gmra.mxu2 %v208_v23  ;;  %v200_v23 = vld [vmem:[%s2160_s2 + $0x58] sm:$0xff] }
  0xa3   :  { %511 = vmatmul.f32.gmra.mxu2 %v209_v28  ;;  %v1965_v28 = vld [vmem:[#allocation2 + $0x68] sm:$0xff] }
  0xa7   :  { %v1975_v41 = vpop.permute.xlu0 %305  ;;  %v1987_v56 = vpop.permute.xlu1 %315 }
  0xab   :  { %514 = vmatmul.f32.gmra.mxu2 %v210_v30  ;;  %v761_v30 = vld [vmem:[#allocation10 + $0x78] sm:$0xff] }
  0xb3   :  { %517 = vmatmul.f32.gmra.mxu2 %v211_v32  ;;  %v594_v32 = vld [vmem:[#allocation8 + $0x70] sm:$0xff] }
  0xbb   :  { %520 = vmatmul.f32.gmra.mxu2 %v212_v34  ;;  %v1971_v34 = vld [vmem:[#allocation2 + $0x70] sm:$0xff] }
  0xc0   :  { %v1865_v49 = vpop.f32.mrf.mxu0 }
  0xc3   :  { %523 = vmatmul.f32.gmra.mxu2 %v1792_v16  ;;  %v1926_v16 = vld [vmem:[#allocation2 + $0x48] sm:$0xff] }
  0xc6   :  { %v278_v48 = vpop.f32.mrf.mxu2 }
  0xc8   :  { %v1867_v51 = vpop.f32.mrf.mxu0 }
  0xcb   :  { %526 = vmatmul.f32.gmra.mxu2 %v1804_v18  ;;  %v1934_v18 = vld [vmem:[#allocation2 + $0x10] sm:$0xff] }
  0xce   :  { %v281_v50 = vpop.f32.mrf.mxu2 }
  0xd0   :  { %v1869_v54 = vpop.f32.mrf.mxu0 }
  0xd3   :  { %529 = vmatmul.f32.gmra.mxu2 %v1813_v20  ;;  %v197_v20 = vld [vmem:[%s2160_s2 + $0x40] sm:$0xff] }
  0xd4   :  { %345 = vperm.xlu2 %1308, %v197_v20   ;;  %v581_v20 = vld [vmem:[#allocation8 + $0x8] sm:$0xff] }
  0xd6   :  { %v284_v52 = vpop.f32.mrf.mxu2 }
  0xd8   :  { %v263_v57 = vpop.f32.mrf.mxu0 }
  0xdb   :  { %532 = vmatmul.f32.gmra.mxu2 %v1822_v22  ;;  %v1946_v22 = vld [vmem:[#allocation2 + $0x58] sm:$0xff] }
  0xdc   :  { %360 = vperm.xlu2 %1308, %v200_v23   ;;  %v747_v23 = vld [vmem:[#allocation10 + $0x8] sm:$0xff] }
  0xde   :  { %v287_v55 = vpop.f32.mrf.mxu2 }
  0xe0   :  { %v266_v61 = vpop.f32.mrf.mxu0 }
  0xe3   :  { %535 = vmatmul.f32.gmra.mxu2 %v1831_v27  ;;  %v1963_v27 = vld [vmem:[#allocation2 + $0x28] sm:$0xff] }
  0xe4   :  { %375 = vperm.xlu2 %1308, %v203_v26  }
  0xe6   :  { %v290_v58 = vpop.f32.mrf.mxu2 }
  0xe8   :  { %v269_v2 = vpop.f32.mrf.mxu0 }
  0xeb   :  { %538 = vmatmul.f32.gmra.mxu2 %v1840_v29  ;;  %v595_v29 = vld [vmem:[#allocation8 + $0x78] sm:$0xff] }
  0xee   :  { %v293_v60 = vpop.f32.mrf.mxu2 }
  0xf0   :  { %v272_v6 = vpop.f32.mrf.mxu0 }
  0xf3   :  { %541 = vmatmul.f32.gmra.mxu2 %v1849_v31  ;;  %v1969_v31 = vld [vmem:[#allocation2 + $0x30] sm:$0xff] }
  0xf6   :  { %v296_v63 = vpop.f32.mrf.mxu2 }
  0xf8   :  { %v275_v9 = vpop.f32.mrf.mxu0 }
  0xfb   :  { %544 = vmatmul.f32.gmra.mxu2 %v1858_v33  ;;  %v760_v33 = vld [vmem:[#allocation10 + $0x70] sm:$0xff] }
  0xfe   :  { %v299_v3 = vpop.f32.mrf.mxu2 }
  0xff   :  { %402 = vmatpush.msra.mxu1 %v299_v3  ;;  %1278 = vmatpush.msra.mxu3 %v299_v3 }
 0x101   :  { %403 = vmatpush.msra.mxu1 %v296_v63  ;;  %1279 = vmatpush.msra.mxu3 %v296_v63 }
 0x103   :  { %404 = vmatpush.msra.mxu1 %v293_v60  ;;  %1280 = vmatpush.msra.mxu3 %v293_v60  ;;  %v1311_v60 = vld [vmem:[%s2168_s10] ss:$0 sm:$0xff] }
 0x105   :  { %405 = vmatpush.msra.mxu1 %v290_v58  ;;  %1281 = vmatpush.msra.mxu3 %v290_v58  ;;  %v1991_v58 = vpop.permute.xlu1 %320 }
 0x106   :  { %v500_v0 = vpop.f32.mrf.mxu2 }
 0x107   :  { %406 = vmatpush.msra.mxu1 %v287_v55  ;;  %1282 = vmatpush.msra.mxu3 %v287_v55 }
 0x109   :  { %407 = vmatpush.msra.mxu1 %v284_v52  ;;  %1283 = vmatpush.msra.mxu3 %v284_v52  ;;  %v1983_v52 = vpop.permute.xlu0 %310 }
 0x10b   :  { %408 = vmatpush.msra.mxu1 %v281_v50  ;;  %1284 = vmatpush.msra.mxu3 %v281_v50  ;;  %v587_v50 = vld [vmem:[#allocation8 + $0x38] sm:$0xff] }
 0x10d   :  { %409 = vmatpush.msra.mxu1 %v278_v48  ;;  %1285 = vmatpush.msra.mxu3 %v278_v48  ;;  %v588_v48 = vld [vmem:[#allocation8 + $0x40] sm:$0xff]  ;;  %v2000_v62 = vpop.permute.xlu1 %340 }
 0x10e   :  { %v503_v26 = vpop.f32.mrf.mxu2 }
 0x10f   :  { %410 = vmatpush.msra.mxu1 %v275_v9  ;;  %1286 = vmatpush.msra.mxu3 %v275_v9  ;;  %v749_v9 = vld [vmem:[#allocation10 + $0x18] sm:$0xff] }
 0x111   :  { %411 = vmatpush.msra.mxu1 %v272_v6  ;;  %1287 = vmatpush.msra.mxu3 %v272_v6  ;;  %v1985_v55 = vpop.permute.xlu0 %335 }
 0x113   :  { %412 = vmatpush.msra.mxu1 %v269_v2  ;;  %1288 = vmatpush.msra.mxu3 %v269_v2  ;;  %v751_v2 = vld [vmem:[#allocation10 + $0x28] sm:$0xff] }
 0x115   :  { %413 = vmatpush.msra.mxu1 %v266_v61  ;;  %1289 = vmatpush.msra.mxu3 %v266_v61  ;;  %v1998_v61 = vpop.permute.xlu2 %325  ;;  %v2015_v17 = vpop.permute.xlu1 %355 }
 0x117   :  { %414 = vmatpush.msra.mxu1 %v263_v57  ;;  %1290 = vmatpush.msra.mxu3 %v263_v57 }
 0x119   :  { %415 = vmatpush.msra.mxu1 %v1869_v54  ;;  %1291 = vmatpush.msra.mxu3 %v1869_v54  ;;  %v752_v54 = vld [vmem:[#allocation10 + $0x30] sm:$0xff]  ;;  %v1989_v57 = vpop.permute.xlu0 %350 }
 0x11a   :  { %v2008_v6 = vmul.f32 %v1311_v60, %v1989_v57 }
 0x11b   :  { %416 = vmatpush.msra.mxu1 %v1867_v51  ;;  %1292 = vmatpush.msra.mxu3 %v1867_v51  ;;  %v753_v51 = vld [vmem:[#allocation10 + $0x38] sm:$0xff] }
 0x11d   :  { %417 = vmatpush.msra.mxu1 %v1865_v49  ;;  %1293 = vmatpush.msra.mxu3 %v1865_v49  ;;  %v754_v49 = vld [vmem:[#allocation10 + $0x40] sm:$0xff]  ;;  %v2013_v10 = vpop.permute.xlu2 %330 }
 0x11e   :  { %418 = vmatmul.f32.vlgmr.msra.gmra.mxu1 %v1912_v12  ;;  %442 = vmatmul.f32.vlgmr.msra.gmra.mxu3 %v1914_v13 }
 0x11f   :  { %596 = vmatpush.msrb.mxu3 %v595_v29  ;;  %762 = vmatpush.msrb.mxu1 %v761_v30  ;;  %v580_v29 = vld [vmem:[#allocation8] sm:$0xff] }
 0x120   :  { %v746_v30 = vld [vmem:[#allocation10] sm:$0xff] }
 0x121   :  { %597 = vmatpush.msrb.mxu3 %v594_v32  ;;  %763 = vmatpush.msrb.mxu1 %v760_v33  ;;  %v1993_v59 = vpop.permute.xlu0 %365  ;;  %v2019_v33 = vpop.permute.xlu1 %370 }
 0x122   :  { %v2011_v7 = vmul.f32 %v1311_v60, %v1993_v59 }
 0x123   :  { %598 = vmatpush.msrb.mxu3 %v593_v35  ;;  %764 = vmatpush.msrb.mxu1 %v759_v36  ;;  %v2022_v35 = vmul.f32 %v1311_v60, %v2019_v33  ;;  %v2025_v36 = vmul.f32 %v1311_v60, %v2015_v17 }
 0x125   :  { %599 = vmatpush.msrb.mxu3 %v592_v37  ;;  %765 = vmatpush.msrb.mxu1 %v758_v38  ;;  %v506_v37 = vpop.f32.mrf.mxu2 }
 0x126   :  { %421 = vmatmul.f32.gmra.mxu1 %v1924_v15  ;;  %445 = vmatmul.f32.gmra.mxu3 %v1926_v16 }
 0x127   :  { %600 = vmatpush.msrb.mxu3 %v591_v39  ;;  %766 = vmatpush.msrb.mxu1 %v757_v40  ;;  %v2032_v39 = vld [vmem:[%s2162_s4] ss:$0 sm:$0xff] }
 0x128   :  { %v386_v40 = vmul.f32 %v2032_v39, %v1975_v41 }
 0x129   :  { %601 = vmatpush.msrb.mxu3 %v590_v44  ;;  %767 = vmatpush.msrb.mxu1 %v756_v45  ;;  %v2002_v63 = vpop.permute.xlu0 %380 }
 0x12a   :  { %v2005_v3 = vmul.f32 %v1311_v60, %v2002_v63 }
 0x12b   :  { %602 = vmatpush.msrb.mxu3 %v589_v46  ;;  %768 = vmatpush.msrb.mxu1 %v755_v47 }
 0x12d   :  { %603 = vmatpush.msrb.mxu3 %v588_v48  ;;  %769 = vmatpush.msrb.mxu1 %v754_v49  ;;  %v509_v44 = vpop.f32.mrf.mxu2 }
 0x12e   :  { %424 = vmatmul.f32.gmra.mxu1 %v1934_v18  ;;  %448 = vmatmul.f32.gmra.mxu3 %v1936_v19  ;;  %v2017_v32 = vpop.permute.xlu2 %345 }
 0x12f   :  { %604 = vmatpush.msrb.mxu3 %v587_v50  ;;  %770 = vmatpush.msrb.mxu1 %v753_v51  ;;  %v2042_v48 = vmul.f32 %v1311_v60, %v2017_v32 }
 0x131   :  { %605 = vmatpush.msrb.mxu3 %v586_v53  ;;  %771 = vmatpush.msrb.mxu1 %v752_v54  ;;  %v387_v53 = vmul.f32 %v2032_v39, %v1983_v52 }
 0x133   :  { %606 = vmatpush.msrb.mxu3 %v585_v1  ;;  %772 = vmatpush.msrb.mxu1 %v751_v2 }
 0x135   :  { %607 = vmatpush.msrb.mxu3 %v584_v4  ;;  %773 = vmatpush.msrb.mxu1 %v750_v5  ;;  %v512_v54 = vpop.f32.mrf.mxu2 }
 0x136   :  { %427 = vmatmul.f32.gmra.mxu1 %v1944_v21  ;;  %451 = vmatmul.f32.gmra.mxu3 %v1946_v22  ;;  %v2027_v38 = vpop.permute.xlu2 %360 }
 0x137   :  { %608 = vmatpush.msrb.mxu3 %v583_v8  ;;  %774 = vmatpush.msrb.mxu1 %v749_v9  ;;  %v2045_v50 = vmul.f32 %v1311_v60, %v2027_v38  ;;  %v388_v8 = vmul.f32 %v2032_v39, %v1987_v56 }
 0x139   :  { %609 = vmatpush.msrb.mxu3 %v582_v11  ;;  %775 = vmatpush.msrb.mxu1 %v748_v14 }
 0x13b   :  { %610 = vmatpush.msrb.mxu3 %v581_v20  ;;  %776 = vmatpush.msrb.mxu1 %v747_v23  ;;  %v389_v20 = vmul.f32 %v2032_v39, %v1991_v58 }
 0x13d   :  { %611 = vmatpush.msrb.mxu3 %v580_v29  ;;  %777 = vmatpush.msrb.mxu1 %v746_v30 }
 0x13e   :  { %430 = vmatmul.f32.gmra.mxu1 %v1954_v24  ;;  %454 = vmatmul.f32.gmra.mxu3 %v1956_v25  ;;  %v2036_v45 = vpop.permute.xlu2 %375 }
 0x13f   :  { %v2039_v46 = vmul.f32 %v1311_v60, %v2036_v45  ;;  %v515_v60 = vpop.f32.mrf.mxu2 }
 0x146   :  { %433 = vmatmul.f32.gmra.mxu1 %v1963_v27  ;;  %457 = vmatmul.f32.gmra.mxu3 %v1965_v28 }
 0x14e   :  { %436 = vmatmul.f32.gmra.mxu1 %v1969_v31  ;;  %460 = vmatmul.f32.gmra.mxu3 %v1971_v34 }
 0x156   :  { %439 = vmatmul.f32.gmra.mxu1 %v1977_v42  ;;  %463 = vmatmul.f32.gmra.mxu3 %v1979_v43 }
 0x19b   :  { %v419_v47 = vpop.f32.mrf.mxu1 }
 0x19c   :  { %v420_v49 = vadd.f32 %v419_v47, %v386_v40  ;;  %v518_v40 = vpop.f32.mrf.mxu2  ;;  %v390_v47 = vmul.f32 %v2032_v39, %v1998_v61 }
 0x19e   :  { %v548_v51 = vadd.f32 %v500_v0, %v420_v49 }
 0x1a0   :  { %1313 = vtanh.f32 %v548_v51 }
 0x1a3   :  { %v422_v1 = vpop.f32.mrf.mxu1 }
 0x1a4   :  { %v423_v2 = vadd.f32 %v422_v1, %v387_v53  ;;  %v521_v1 = vpop.f32.mrf.mxu2 }
 0x1a6   :  { %v1314_v4 = vpop.eup %1313  ;;  %v549_v5 = vadd.f32 %v503_v26, %v423_v2  ;;  %v391_v2 = vmul.f32 %v2032_v39, %v2013_v10 }
 0x1a7   :  { %612 = vmatmul.f32.vlgmr.msrb.gmra.mxu3 %v1314_v4  ;;  %778 = vmatmul.f32.vlgmr.msrb.gmra.mxu1 %v1314_v4 }
 0x1a8   :  { %1315 = vtanh.f32 %v549_v5 }
 0x1ab   :  { %v425_v9 = vpop.f32.mrf.mxu1 }
 0x1ac   :  { %v426_v11 = vadd.f32 %v425_v9, %v388_v8  ;;  %v443_v9 = vpop.f32.mrf.mxu3 }
 0x1ae   :  { %v1316_v14 = vpop.eup %1315  ;;  %v550_v0 = vadd.f32 %v506_v37, %v426_v11  ;;  %v392_v11 = vmul.f32 %v2032_v39, %v1985_v55 }
 0x1af   :  { %615 = vmatmul.f32.gmra.mxu3 %v1316_v14  ;;  %781 = vmatmul.f32.gmra.mxu1 %v1316_v14  ;;  %v524_v14 = vpop.f32.mrf.mxu2 }
 0x1b0   :  { %1317 = vtanh.f32 %v550_v0 }
 0x1b3   :  { %v428_v23 = vpop.f32.mrf.mxu1 }
 0x1b4   :  { %v429_v29 = vadd.f32 %v428_v23, %v389_v20 }
 0x1b6   :  { %v1318_v26 = vpop.eup %1317  ;;  %v551_v30 = vadd.f32 %v509_v44, %v429_v29  ;;  %v446_v29 = vpop.f32.mrf.mxu3 }
 0x1b7   :  { %618 = vmatmul.f32.gmra.mxu3 %v1318_v26  ;;  %784 = vmatmul.f32.gmra.mxu1 %v1318_v26  ;;  %v393_v26 = vmul.f32 %v2032_v39, %v2000_v62 }
 0x1b8   :  { %1319 = vtanh.f32 %v551_v30  ;;  %v394_v30 = vmul.f32 %v2032_v39, %v2017_v32 }
 0x1bb   :  { %v431_v49 = vpop.f32.mrf.mxu1 }
 0x1bc   :  { %v432_v51 = vadd.f32 %v431_v49, %v390_v47  ;;  %v527_v49 = vpop.f32.mrf.mxu2 }
 0x1be   :  { %v1320_v37 = vpop.eup %1319  ;;  %v552_v53 = vadd.f32 %v512_v54, %v432_v51 }
 0x1bf   :  { %621 = vmatmul.f32.gmra.mxu3 %v1320_v37  ;;  %787 = vmatmul.f32.gmra.mxu1 %v1320_v37 }
 0x1c0   :  { %1321 = vtanh.f32 %v552_v53  ;;  %v444_v53 = vadd.f32 %v443_v9, %v394_v30 }
 0x1c3   :  { %v434_v4 = vpop.f32.mrf.mxu1 }
 0x1c4   :  { %v435_v44 = vadd.f32 %v434_v4, %v391_v2  ;;  %v556_v2 = vadd.f32 %v524_v14, %v444_v53 }
 0x1c6   :  { %v1322_v5 = vpop.eup %1321  ;;  %v553_v8 = vadd.f32 %v515_v60, %v435_v44  ;;  %v395_v44 = vmul.f32 %v2032_v39, %v1989_v57 }
 0x1c7   :  { %624 = vmatmul.f32.gmra.mxu3 %v1322_v5  ;;  %790 = vmatmul.f32.gmra.mxu1 %v1322_v5  ;;  %v530_v5 = vpop.f32.mrf.mxu2 }
 0x1c8   :  { %1323 = vtanh.f32 %v553_v8  ;;  %v447_v8 = vadd.f32 %v446_v29, %v395_v44  ;;  %v399_v44 = vmul.f32 %v2032_v39, %v2019_v33 }
 0x1cb   :  { %v437_v54 = vpop.f32.mrf.mxu1 }
 0x1cc   :  { %v438_v0 = vadd.f32 %v437_v54, %v392_v11  ;;  %v557_v11 = vadd.f32 %v527_v49, %v447_v8 }
 0x1ce   :  { %v1324_v20 = vpop.eup %1323  ;;  %v554_v23 = vadd.f32 %v518_v40, %v438_v0  ;;  %v449_v40 = vpop.f32.mrf.mxu3 }
 0x1cf   :  { %627 = vmatmul.f32.gmra.mxu3 %v1324_v20  ;;  %793 = vmatmul.f32.gmra.mxu1 %v1324_v20  ;;  %v533_v14 = vpop.f32.mrf.mxu2  ;;  %v397_v20 = vmul.f32 %v2032_v39, %v2027_v38 }
 0x1d0   :  { %1325 = vtanh.f32 %v554_v23 }
 0x1d3   :  { %v440_v60 = vpop.f32.mrf.mxu1 }
 0x1d4   :  { %v441_v47 = vadd.f32 %v440_v60, %v393_v26 }
 0x1d6   :  { %v1326_v51 = vpop.eup %1325  ;;  %v555_v37 = vadd.f32 %v521_v1, %v441_v47  ;;  %v452_v54 = vpop.f32.mrf.mxu3  ;;  %v396_v1 = vmul.f32 %v2032_v39, %v2015_v17 }
 0x1d7   :  { %630 = vmatmul.f32.gmra.mxu3 %v1326_v51  ;;  %796 = vmatmul.f32.gmra.mxu1 %v1326_v51  ;;  %v453_v29 = vadd.f32 %v452_v54, %v397_v20  ;;  %v536_v30 = vpop.f32.mrf.mxu2  ;;  %v398_v51 = vmul.f32 %v2032_v39, %v1993_v59 }
 0x1d8   :  { %1327 = vtanh.f32 %v555_v37  ;;  %v450_v9 = vadd.f32 %v449_v40, %v396_v1 }
 0x1d9   :  { %1329 = vtanh.f32 %v556_v2  ;;  %v559_v47 = vadd.f32 %v533_v14, %v453_v29 }
 0x1da   :  { %1331 = vtanh.f32 %v557_v11  ;;  %v558_v23 = vadd.f32 %v530_v5, %v450_v9 }
 0x1dc   :  { %1333 = vtanh.f32 %v558_v23 }
 0x1dd   :  { %1335 = vtanh.f32 %v559_v47 }
 0x1de   :  { %v1328_v4 = vpop.eup %1327  ;;  %v455_v60 = vpop.f32.mrf.mxu3 }
 0x1df   :  { %633 = vmatmul.f32.gmra.mxu3 %v1328_v4  ;;  %799 = vmatmul.f32.gmra.mxu1 %v1328_v4  ;;  %v1330_v0 = vpop.eup %1329  ;;  %v456_v37 = vadd.f32 %v455_v60, %v398_v51  ;;  %v539_v2 = vpop.f32.mrf.mxu2 }
 0x1e0   :  { %v1332_v26 = vpop.eup %1331 }
 0x1e1   :  { %v560_v40 = vadd.f32 %v536_v30, %v456_v37 }
 0x1e2   :  { %v1334_v49 = vpop.eup %1333 }
 0x1e3   :  { %v1336_v4 = vpop.eup %1335  ;;  %1337 = vtanh.f32 %v560_v40 }
 0x1e6   :  { %v458_v53 = vpop.f32.mrf.mxu3 }
 0x1e7   :  { %636 = vmatmul.f32.gmra.mxu3 %v1330_v0  ;;  %802 = vmatmul.f32.gmra.mxu1 %v1330_v0  ;;  %v459_v5 = vadd.f32 %v458_v53, %v399_v44  ;;  %v400_v0 = vmul.f32 %v2032_v39, %v2036_v45  ;;  %v542_v1 = vpop.f32.mrf.mxu2 }
 0x1e9   :  { %v561_v11 = vadd.f32 %v539_v2, %v459_v5  ;;  %v1338_v54 = vpop.eup %1337 }
 0x1eb   :  { %1339 = vtanh.f32 %v561_v11 }
 0x1ee   :  { %v461_v8 = vpop.f32.mrf.mxu3 }
 0x1ef   :  { %639 = vmatmul.f32.gmra.mxu3 %v1332_v26  ;;  %805 = vmatmul.f32.gmra.mxu1 %v1332_v26  ;;  %v462_v9 = vadd.f32 %v461_v8, %v400_v0  ;;  %v401_v26 = vmul.f32 %v2032_v39, %v2002_v63  ;;  %v545_v29 = vpop.f32.mrf.mxu2 }
 0x1f1   :  { %v562_v14 = vadd.f32 %v542_v1, %v462_v9  ;;  %v1340_v23 = vpop.eup %1339 }
 0x1f3   :  { %1341 = vtanh.f32 %v562_v14 }
 0x1f6   :  { %v464_v20 = vpop.f32.mrf.mxu3 }
 0x1f7   :  { %642 = vmatmul.f32.gmra.mxu3 %v1334_v49  ;;  %808 = vmatmul.f32.gmra.mxu1 %v1334_v49  ;;  %v465_v60 = vadd.f32 %v464_v20, %v401_v26  ;;  %v874_v20 = vld [vmem:[#allocation11 + $0x78] sm:$0xff]  ;;  %v868_v26 = vld [vmem:[#allocation11 + $0x48] sm:$0xff] }
 0x1f8   :  { %875 = vmatpush.msra.mxu2 %v874_v20 }
 0x1f9   :  { %v563_v30 = vadd.f32 %v545_v29, %v465_v60  ;;  %v1342_v47 = vpop.eup %1341  ;;  %v1034_v60 = vld [vmem:[#allocation13 + $0x48] sm:$0xff]  ;;  %v867_v29 = vld [vmem:[#allocation11 + $0x40] sm:$0xff] }
 0x1fb   :  { %1343 = vtanh.f32 %v563_v30  ;;  %v1033_v30 = vld [vmem:[#allocation13 + $0x40] sm:$0xff] }
 0x1ff   :  { %645 = vmatmul.f32.gmra.mxu3 %v1336_v4  ;;  %811 = vmatmul.f32.gmra.mxu1 %v1336_v4 }
 0x201   :  { %v1344_v49 = vpop.eup %1343 }
 0x207   :  { %648 = vmatmul.f32.gmra.mxu3 %v1338_v54  ;;  %814 = vmatmul.f32.gmra.mxu1 %v1338_v54 }
 0x20f   :  { %651 = vmatmul.f32.gmra.mxu3 %v1340_v23  ;;  %817 = vmatmul.f32.gmra.mxu1 %v1340_v23  ;;  %v873_v23 = vld [vmem:[#allocation11 + $0x70] sm:$0xff] }
 0x210   :  { %876 = vmatpush.msra.mxu2 %v873_v23 }
 0x217   :  { %654 = vmatmul.f32.gmra.mxu3 %v1342_v47  ;;  %820 = vmatmul.f32.gmra.mxu1 %v1342_v47  ;;  %v1032_v47 = vld [vmem:[#allocation13 + $0x38] sm:$0xff] }
 0x21f   :  { %657 = vmatmul.f32.gmra.mxu3 %v1344_v49  ;;  %823 = vmatmul.f32.gmra.mxu1 %v1344_v49  ;;  %v865_v49 = vld [vmem:[#allocation11 + $0x30] sm:$0xff] }
 0x22a   :  { %v613_v51 = vpop.f32.mrf.mxu3 }
 0x232   :  { %v616_v37 = vpop.f32.mrf.mxu3 }
 0x23a   :  { %v619_v53 = vpop.f32.mrf.mxu3 }
 0x242   :  { %v622_v40 = vpop.f32.mrf.mxu3 }
 0x24a   :  { %v625_v2 = vpop.f32.mrf.mxu3 }
 0x252   :  { %v628_v4 = vpop.f32.mrf.mxu3 }
 0x25a   :  { %v631_v39 = vpop.f32.mrf.mxu3 }
 0x262   :  { %v634_v44 = vpop.f32.mrf.mxu3 }
 0x26a   :  { %v637_v5 = vpop.f32.mrf.mxu3 }
 0x272   :  { %v640_v8 = vpop.f32.mrf.mxu3 }
 0x27a   :  { %v643_v11 = vpop.f32.mrf.mxu3 }
 0x282   :  { %v646_v54 = vpop.f32.mrf.mxu3 }
 0x28a   :  { %v649_v0 = vpop.f32.mrf.mxu3 }
 0x292   :  { %v652_v1 = vpop.f32.mrf.mxu3 }
 0x29a   :  { %v655_v9 = vpop.f32.mrf.mxu3 }
 0x2a2   :  { %v658_v14 = vpop.f32.mrf.mxu3 }
 0x2a3   :  { %681 = vmatpush.msrb.mxu0 %v658_v14 }
 0x2a5   :  { %682 = vmatpush.msrb.mxu0 %v655_v9  ;;  %v2095_v9 = vld [vmem:[%s2165_s7] ss:$0 sm:$0xff] }
 0x2a6   :  { %v665_v14 = vmul.f32 %v2095_v9, %v1975_v41 }
 0x2a7   :  { %683 = vmatpush.msrb.mxu0 %v652_v1 }
 0x2a9   :  { %684 = vmatpush.msrb.mxu0 %v649_v0  ;;  %v1025_v0 = vld [vmem:[#allocation13] sm:$0xff] }
 0x2ab   :  { %685 = vmatpush.msrb.mxu0 %v646_v54  ;;  %v859_v54 = vld [vmem:[#allocation11] sm:$0xff] }
 0x2ad   :  { %686 = vmatpush.msrb.mxu0 %v643_v11  ;;  %v1026_v11 = vld [vmem:[#allocation13 + $0x8] sm:$0xff] }
 0x2af   :  { %687 = vmatpush.msrb.mxu0 %v640_v8  ;;  %v860_v8 = vld [vmem:[#allocation11 + $0x8] sm:$0xff] }
 0x2b1   :  { %688 = vmatpush.msrb.mxu0 %v637_v5  ;;  %v1027_v5 = vld [vmem:[#allocation13 + $0x10] sm:$0xff] }
 0x2b3   :  { %689 = vmatpush.msrb.mxu0 %v634_v44  ;;  %v861_v44 = vld [vmem:[#allocation11 + $0x10] sm:$0xff] }
 0x2b5   :  { %690 = vmatpush.msrb.mxu0 %v631_v39  ;;  %v1028_v39 = vld [vmem:[#allocation13 + $0x18] sm:$0xff] }
 0x2b7   :  { %691 = vmatpush.msrb.mxu0 %v628_v4  ;;  %v862_v4 = vld [vmem:[#allocation11 + $0x18] sm:$0xff] }
 0x2b9   :  { %692 = vmatpush.msrb.mxu0 %v625_v2  ;;  %v1029_v2 = vld [vmem:[#allocation13 + $0x20] sm:$0xff] }
 0x2bb   :  { %693 = vmatpush.msrb.mxu0 %v622_v40  ;;  %v863_v40 = vld [vmem:[#allocation11 + $0x20] sm:$0xff] }
 0x2bd   :  { %694 = vmatpush.msrb.mxu0 %v619_v53  ;;  %v1030_v53 = vld [vmem:[#allocation13 + $0x28] sm:$0xff] }
 0x2bf   :  { %695 = vmatpush.msrb.mxu0 %v616_v37  ;;  %v864_v37 = vld [vmem:[#allocation11 + $0x28] sm:$0xff] }
 0x2c1   :  { %696 = vmatpush.msrb.mxu0 %v613_v51  ;;  %v1031_v51 = vld [vmem:[#allocation13 + $0x30] sm:$0xff] }
 0x2c2   :  { %697 = vmatmul.f32.vlgmr.msrb.gmra.mxu0 %v1912_v12  ;;  %v1040_v12 = vld [vmem:[#allocation13 + $0x78] sm:$0xff] }
 0x2c3   :  { %1041 = vmatpush.msra.mxu0 %v1040_v12 }
 0x2ca   :  { %700 = vmatmul.f32.gmra.mxu0 %v1924_v15  ;;  %v1039_v15 = vld [vmem:[#allocation13 + $0x70] sm:$0xff] }
 0x2cb   :  { %1042 = vmatpush.msra.mxu0 %v1039_v15  ;;  %v666_v15 = vmul.f32 %v2095_v9, %v1983_v52 }
 0x2d2   :  { %703 = vmatmul.f32.gmra.mxu0 %v1934_v18  ;;  %v872_v18 = vld [vmem:[#allocation11 + $0x68] sm:$0xff] }
 0x2d3   :  { %877 = vmatpush.msra.mxu2 %v872_v18 }
 0x2da   :  { %706 = vmatmul.f32.gmra.mxu0 %v1944_v21  ;;  %v1038_v21 = vld [vmem:[#allocation13 + $0x68] sm:$0xff] }
 0x2db   :  { %1043 = vmatpush.msra.mxu0 %v1038_v21 }
 0x2e2   :  { %709 = vmatmul.f32.gmra.mxu0 %v1954_v24  ;;  %v871_v24 = vld [vmem:[#allocation11 + $0x60] sm:$0xff] }
 0x2e3   :  { %878 = vmatpush.msra.mxu2 %v871_v24 }
 0x2ea   :  { %712 = vmatmul.f32.gmra.mxu0 %v1963_v27  ;;  %v1037_v27 = vld [vmem:[#allocation13 + $0x60] sm:$0xff] }
 0x2eb   :  { %1044 = vmatpush.msra.mxu0 %v1037_v27 }
 0x2f2   :  { %715 = vmatmul.f32.gmra.mxu0 %v1969_v31  ;;  %v1036_v31 = vld [vmem:[#allocation13 + $0x58] sm:$0xff] }
 0x2f3   :  { %1045 = vmatpush.msra.mxu0 %v1036_v31 }
 0x2fa   :  { %718 = vmatmul.f32.gmra.mxu0 %v1977_v42  ;;  %v1035_v42 = vld [vmem:[#allocation13 + $0x50] sm:$0xff] }
 0x2fb   :  { %1046 = vmatpush.msra.mxu0 %v1035_v42 }
 0x2fd   :  { %1047 = vmatpush.msra.mxu0 %v1034_v60  ;;  %v668_v60 = vmul.f32 %v2095_v9, %v1991_v58 }
 0x2ff   :  { %1048 = vmatpush.msra.mxu0 %v1033_v30 }
 0x301   :  { %1049 = vmatpush.msra.mxu0 %v1032_v47 }
 0x302   :  { %721 = vmatmul.f32.gmra.mxu0 %v1914_v13  ;;  %v870_v13 = vld [vmem:[#allocation11 + $0x58] sm:$0xff] }
 0x303   :  { %879 = vmatpush.msra.mxu2 %v870_v13  ;;  %1050 = vmatpush.msra.mxu0 %v1031_v51 }
 0x305   :  { %1051 = vmatpush.msra.mxu0 %v1030_v53 }
 0x307   :  { %1052 = vmatpush.msra.mxu0 %v1029_v2 }
 0x309   :  { %1053 = vmatpush.msra.mxu0 %v1028_v39 }
 0x30a   :  { %724 = vmatmul.f32.gmra.mxu0 %v1926_v16  ;;  %v869_v16 = vld [vmem:[#allocation11 + $0x50] sm:$0xff] }
 0x30b   :  { %880 = vmatpush.msra.mxu2 %v869_v16  ;;  %1054 = vmatpush.msra.mxu0 %v1027_v5 }
 0x30d   :  { %881 = vmatpush.msra.mxu2 %v868_v26  ;;  %1055 = vmatpush.msra.mxu0 %v1026_v11  ;;  %v671_v11 = vmul.f32 %v2095_v9, %v1985_v55 }
 0x30f   :  { %882 = vmatpush.msra.mxu2 %v867_v29  ;;  %1056 = vmatpush.msra.mxu0 %v1025_v0 }
 0x312   :  { %727 = vmatmul.f32.gmra.mxu0 %v1936_v19  ;;  %v866_v19 = vld [vmem:[#allocation11 + $0x38] sm:$0xff] }
 0x313   :  { %883 = vmatpush.msra.mxu2 %v866_v19 }
 0x315   :  { %884 = vmatpush.msra.mxu2 %v865_v49  ;;  %v669_v49 = vmul.f32 %v2095_v9, %v1998_v61 }
 0x317   :  { %885 = vmatpush.msra.mxu2 %v864_v37 }
 0x319   :  { %886 = vmatpush.msra.mxu2 %v863_v40 }
 0x31a   :  { %730 = vmatmul.f32.gmra.mxu0 %v1946_v22  ;;  %v779_v22 = vpop.f32.mrf.mxu1 }
 0x31b   :  { %887 = vmatpush.msra.mxu2 %v862_v4 }
 0x31d   :  { %888 = vmatpush.msra.mxu2 %v861_v44 }
 0x31f   :  { %889 = vmatpush.msra.mxu2 %v860_v8 }
 0x321   :  { %890 = vmatpush.msra.mxu2 %v859_v54 }
 0x322   :  { %733 = vmatmul.f32.gmra.mxu0 %v1956_v25  ;;  %v782_v25 = vpop.f32.mrf.mxu1 }
 0x32a   :  { %736 = vmatmul.f32.gmra.mxu0 %v1965_v28  ;;  %v785_v1 = vpop.f32.mrf.mxu1 }
 0x332   :  { %739 = vmatmul.f32.gmra.mxu0 %v1971_v34  ;;  %v788_v23 = vpop.f32.mrf.mxu1 }
 0x33a   :  { %742 = vmatmul.f32.gmra.mxu0 %v1979_v43  ;;  %v791_v27 = vpop.f32.mrf.mxu1  ;;  %v667_v43 = vmul.f32 %v2095_v9, %v1987_v56 }
 0x33f   :  { %v698_v20 = vpop.f32.mrf.mxu0 }
 0x340   :  { %v699_v12 = vadd.f32 %v698_v20, %v665_v14  ;;  %v672_v20 = vmul.f32 %v2095_v9, %v2000_v62 }
 0x342   :  { %v827_v28 = vadd.f32 %v779_v22, %v699_v12  ;;  %v794_v26 = vpop.f32.mrf.mxu1  ;;  %v670_v22 = vmul.f32 %v2095_v9, %v2013_v10 }
 0x344   :  { %1345 = vtanh.f32 %v827_v28 }
 0x347   :  { %v701_v34 = vpop.f32.mrf.mxu0 }
 0x348   :  { %v702_v18 = vadd.f32 %v701_v34, %v666_v15 }
 0x34a   :  { %v1346_v21 = vpop.eup %1345  ;;  %v828_v24 = vadd.f32 %v782_v25, %v702_v18  ;;  %v797_v51 = vpop.f32.mrf.mxu1  ;;  %v673_v18 = vmul.f32 %v2095_v9, %v2017_v32  ;;  %v675_v32 = vmul.f32 %v2095_v9, %v2015_v17  ;;  %v677_v17 = vmul.f32 %v2095_v9, %v1993_v59 }
 0x34b   :  { %891 = vmatmul.f32.vlgmr.msra.gmra.mxu2 %v1346_v21  ;;  %1057 = vmatmul.f32.vlgmr.msra.gmra.mxu0 %v1346_v21  ;;  %v679_v59 = vmul.f32 %v2095_v9, %v2036_v45 }
 0x34c   :  { %1347 = vtanh.f32 %v828_v24 }
 0x34f   :  { %v704_v13 = vpop.f32.mrf.mxu0 }
 0x350   :  { %v705_v31 = vadd.f32 %v704_v13, %v667_v43  ;;  %v674_v13 = vmul.f32 %v2095_v9, %v1989_v57  ;;  %v676_v57 = vmul.f32 %v2095_v9, %v2027_v38  ;;  %v678_v38 = vmul.f32 %v2095_v9, %v2019_v33 }
 0x351   :  { %v680_v33 = vmul.f32 %v2095_v9, %v2002_v63 }
 0x352   :  { %v1348_v16 = vpop.eup %1347  ;;  %v829_v42 = vadd.f32 %v785_v1, %v705_v31  ;;  %v800_v44 = vpop.f32.mrf.mxu1 }
 0x353   :  { %894 = vmatmul.f32.gmra.mxu2 %v1348_v16  ;;  %1060 = vmatmul.f32.gmra.mxu0 %v1348_v16 }
 0x354   :  { %1349 = vtanh.f32 %v829_v42 }
 0x357   :  { %v707_v29 = vpop.f32.mrf.mxu0 }
 0x358   :  { %v708_v30 = vadd.f32 %v707_v29, %v668_v60 }
 0x35a   :  { %v1350_v19 = vpop.eup %1349  ;;  %v830_v47 = vadd.f32 %v788_v23, %v708_v30  ;;  %v803_v14 = vpop.f32.mrf.mxu1 }
 0x35b   :  { %897 = vmatmul.f32.gmra.mxu2 %v1350_v19  ;;  %1063 = vmatmul.f32.gmra.mxu0 %v1350_v19 }
 0x35c   :  { %1351 = vtanh.f32 %v830_v47 }
 0x35f   :  { %v710_v37 = vpop.f32.mrf.mxu0 }
 0x360   :  { %v711_v53 = vadd.f32 %v710_v37, %v669_v49 }
 0x362   :  { %v1352_v40 = vpop.eup %1351  ;;  %v831_v2 = vadd.f32 %v791_v27, %v711_v53  ;;  %v806_v34 = vpop.f32.mrf.mxu1 }
 0x363   :  { %900 = vmatmul.f32.gmra.mxu2 %v1352_v40  ;;  %1066 = vmatmul.f32.gmra.mxu0 %v1352_v40 }
 0x364   :  { %1353 = vtanh.f32 %v831_v2 }
 0x367   :  { %v713_v4 = vpop.f32.mrf.mxu0 }
 0x368   :  { %v714_v39 = vadd.f32 %v713_v4, %v670_v22 }
 0x36a   :  { %v1354_v5 = vpop.eup %1353  ;;  %v832_v8 = vadd.f32 %v794_v26, %v714_v39  ;;  %v809_v31 = vpop.f32.mrf.mxu1 }
 0x36b   :  { %903 = vmatmul.f32.gmra.mxu2 %v1354_v5  ;;  %1069 = vmatmul.f32.gmra.mxu0 %v1354_v5 }
 0x36c   :  { %1355 = vtanh.f32 %v832_v8 }
 0x36f   :  { %v716_v54 = vpop.f32.mrf.mxu0 }
 0x370   :  { %v717_v0 = vadd.f32 %v716_v54, %v671_v11 }
 0x372   :  { %v1356_v25 = vpop.eup %1355  ;;  %v833_v1 = vadd.f32 %v797_v51, %v717_v0  ;;  %v812_v19 = vpop.f32.mrf.mxu1 }
 0x373   :  { %906 = vmatmul.f32.gmra.mxu2 %v1356_v25  ;;  %1072 = vmatmul.f32.gmra.mxu0 %v1356_v25 }
 0x374   :  { %1357 = vtanh.f32 %v833_v1 }
 0x377   :  { %v719_v12 = vpop.f32.mrf.mxu0 }
 0x378   :  { %v720_v23 = vadd.f32 %v719_v12, %v672_v20 }
 0x37a   :  { %v1358_v28 = vpop.eup %1357  ;;  %v834_v15 = vadd.f32 %v800_v44, %v720_v23  ;;  %v815_v2 = vpop.f32.mrf.mxu1 }
 0x37b   :  { %909 = vmatmul.f32.gmra.mxu2 %v1358_v28  ;;  %1075 = vmatmul.f32.gmra.mxu0 %v1358_v28 }
 0x37c   :  { %1359 = vtanh.f32 %v834_v15 }
 0x37f   :  { %v722_v21 = vpop.f32.mrf.mxu0 }
 0x380   :  { %v723_v24 = vadd.f32 %v722_v21, %v673_v18 }
 0x382   :  { %v1360_v27 = vpop.eup %1359  ;;  %v835_v43 = vadd.f32 %v803_v14, %v723_v24  ;;  %v818_v5 = vpop.f32.mrf.mxu1 }
 0x383   :  { %912 = vmatmul.f32.gmra.mxu2 %v1360_v27  ;;  %1078 = vmatmul.f32.gmra.mxu0 %v1360_v27 }
 0x384   :  { %1361 = vtanh.f32 %v835_v43 }
 0x387   :  { %v725_v16 = vpop.f32.mrf.mxu0 }
 0x388   :  { %v726_v42 = vadd.f32 %v725_v16, %v674_v13 }
 0x38a   :  { %v1362_v26 = vpop.eup %1361  ;;  %v836_v60 = vadd.f32 %v806_v34, %v726_v42  ;;  %v821_v25 = vpop.f32.mrf.mxu1 }
 0x38b   :  { %915 = vmatmul.f32.gmra.mxu2 %v1362_v26  ;;  %1081 = vmatmul.f32.gmra.mxu0 %v1362_v26 }
 0x38c   :  { %1363 = vtanh.f32 %v836_v60 }
 0x38f   :  { %v728_v29 = vpop.f32.mrf.mxu0 }
 0x390   :  { %v729_v30 = vadd.f32 %v728_v29, %v675_v32 }
 0x392   :  { %v1364_v47 = vpop.eup %1363  ;;  %v837_v49 = vadd.f32 %v809_v31, %v729_v30  ;;  %v824_v15 = vpop.f32.mrf.mxu1 }
 0x393   :  { %918 = vmatmul.f32.gmra.mxu2 %v1364_v47  ;;  %1084 = vmatmul.f32.gmra.mxu0 %v1364_v47  ;;  %v1409_v47 = vld [vmem:[#allocation2] sm:$0xff] }
 0x394   :  { %1365 = vtanh.f32 %v837_v49  ;;  %v1410_v49 = vld [vmem:[#allocation2 + $0x8] sm:$0xff] }
 0x397   :  { %v731_v51 = vpop.f32.mrf.mxu0 }
 0x398   :  { %v732_v37 = vadd.f32 %v731_v51, %v676_v57  ;;  %v1411_v57 = vld [vmem:[#allocation2 + $0x10] sm:$0xff]  ;;  %v1412_v51 = vld [vmem:[#allocation2 + $0x18] sm:$0xff] }
 0x39a   :  { %v1366_v53 = vpop.eup %1365  ;;  %v838_v40 = vadd.f32 %v812_v19, %v732_v37  ;;  %v1413_v37 = vld [vmem:[#allocation2 + $0x20] sm:$0xff] }
 0x39b   :  { %921 = vmatmul.f32.gmra.mxu2 %v1366_v53  ;;  %1087 = vmatmul.f32.gmra.mxu0 %v1366_v53  ;;  %v1414_v53 = vld [vmem:[#allocation2 + $0x28] sm:$0xff] }
 0x39c   :  { %1367 = vtanh.f32 %v838_v40  ;;  %v1415_v40 = vld [vmem:[#allocation2 + $0x30] sm:$0xff] }
 0x39f   :  { %v734_v22 = vpop.f32.mrf.mxu0 }
 0x3a0   :  { %v735_v4 = vadd.f32 %v734_v22, %v677_v17  ;;  %v1417_v17 = vld [vmem:[#allocation2 + $0x40] sm:$0xff]  ;;  %v1418_v22 = vld [vmem:[#allocation2 + $0x48] sm:$0xff] }
 0x3a2   :  { %v1368_v39 = vpop.eup %1367  ;;  %v839_v44 = vadd.f32 %v815_v2, %v735_v4  ;;  %v1416_v2 = vld [vmem:[#allocation2 + $0x38] sm:$0xff] }
 0x3a3   :  { %924 = vmatmul.f32.gmra.mxu2 %v1368_v39  ;;  %1090 = vmatmul.f32.gmra.mxu0 %v1368_v39  ;;  %v1153_v4 = vld [vmem:[#allocation14 + $0x78] sm:$0xff]  ;;  %v1419_v39 = vld [vmem:[#allocation2 + $0x50] sm:$0xff] }
 0x3a4   :  { %1369 = vtanh.f32 %v839_v44  ;;  %1158 = vmatpush.msra.mxu1 %v1153_v4  ;;  %v1152_v44 = vld [vmem:[#allocation14 + $0x70] sm:$0xff] }
 0x3a6   :  { %1159 = vmatpush.msra.mxu1 %v1152_v44 }
 0x3a7   :  { %v737_v8 = vpop.f32.mrf.mxu0 }
 0x3a8   :  { %v738_v11 = vadd.f32 %v737_v8, %v678_v38  ;;  %v1150_v38 = vld [vmem:[#allocation14 + $0x60] sm:$0xff]  ;;  %v1149_v8 = vld [vmem:[#allocation14 + $0x58] sm:$0xff] }
 0x3aa   :  { %v1370_v54 = vpop.eup %1369  ;;  %v840_v0 = vadd.f32 %v818_v5, %v738_v11  ;;  %v1151_v5 = vld [vmem:[#allocation14 + $0x68] sm:$0xff]  ;;  %v1420_v11 = vld [vmem:[#allocation2 + $0x58] sm:$0xff] }
 0x3ab   :  { %927 = vmatmul.f32.gmra.mxu2 %v1370_v54  ;;  %1093 = vmatmul.f32.gmra.mxu0 %v1370_v54  ;;  %v1148_v54 = vld [vmem:[#allocation14 + $0x50] sm:$0xff] }
 0x3ac   :  { %1371 = vtanh.f32 %v840_v0  ;;  %1160 = vmatpush.msra.mxu1 %v1151_v5  ;;  %v1147_v0 = vld [vmem:[#allocation14 + $0x48] sm:$0xff] }
 0x3ae   :  { %1161 = vmatpush.msra.mxu1 %v1150_v38 }
 0x3af   :  { %v740_v1 = vpop.f32.mrf.mxu0 }
 0x3b0   :  { %v741_v14 = vadd.f32 %v740_v1, %v679_v59  ;;  %1162 = vmatpush.msra.mxu1 %v1149_v8  ;;  %v1146_v59 = vld [vmem:[#allocation14 + $0x40] sm:$0xff]  ;;  %v1144_v1 = vld [vmem:[#allocation14 + $0x30] sm:$0xff] }
 0x3b2   :  { %v1372_v20 = vpop.eup %1371  ;;  %v841_v12 = vadd.f32 %v821_v25, %v741_v14  ;;  %1163 = vmatpush.msra.mxu1 %v1148_v54  ;;  %v1145_v25 = vld [vmem:[#allocation14 + $0x38] sm:$0xff]  ;;  %v1421_v14 = vld [vmem:[#allocation2 + $0x60] sm:$0xff] }
 0x3b3   :  { %930 = vmatmul.f32.gmra.mxu2 %v1372_v20  ;;  %1096 = vmatmul.f32.gmra.mxu0 %v1372_v20  ;;  %v1143_v20 = vld [vmem:[#allocation14 + $0x28] sm:$0xff] }
 0x3b4   :  { %1373 = vtanh.f32 %v841_v12  ;;  %1164 = vmatpush.msra.mxu1 %v1147_v0  ;;  %v1142_v12 = vld [vmem:[#allocation14 + $0x20] sm:$0xff] }
 0x3b6   :  { %1165 = vmatpush.msra.mxu1 %v1146_v59 }
 0x3b7   :  { %v743_v23 = vpop.f32.mrf.mxu0 }
 0x3b8   :  { %v744_v28 = vadd.f32 %v743_v23, %v680_v33  ;;  %1166 = vmatpush.msra.mxu1 %v1145_v25  ;;  %v1141_v23 = vld [vmem:[#allocation14 + $0x18] sm:$0xff] }
 0x3ba   :  { %v1374_v34 = vpop.eup %1373  ;;  %v842_v18 = vadd.f32 %v824_v15, %v744_v28  ;;  %1167 = vmatpush.msra.mxu1 %v1144_v1  ;;  %v1422_v28 = vld [vmem:[#allocation2 + $0x68] sm:$0xff]  ;;  %v1140_v15 = vld [vmem:[#allocation14 + $0x10] sm:$0xff] }
 0x3bb   :  { %933 = vmatmul.f32.gmra.mxu2 %v1374_v34  ;;  %1099 = vmatmul.f32.gmra.mxu0 %v1374_v34  ;;  %v1139_v34 = vld [vmem:[#allocation14 + $0x8] sm:$0xff] }
 0x3bc   :  { %1375 = vtanh.f32 %v842_v18  ;;  %1168 = vmatpush.msra.mxu1 %v1143_v20  ;;  %v1138_v18 = vld [vmem:[#allocation14] sm:$0xff] }
 0x3be   :  { %1169 = vmatpush.msra.mxu1 %v1142_v12 }
 0x3c0   :  { %1170 = vmatpush.msra.mxu1 %v1141_v23 }
 0x3c2   :  { %v1376_v45 = vpop.eup %1375  ;;  %1171 = vmatpush.msra.mxu1 %v1140_v15 }
 0x3c3   :  { %936 = vmatmul.f32.gmra.mxu2 %v1376_v45  ;;  %1102 = vmatmul.f32.gmra.mxu0 %v1376_v45  ;;  %v1423_v45 = vld [vmem:[#allocation2 + $0x70] sm:$0xff] }
 0x3c4   :  { %1172 = vmatpush.msra.mxu1 %v1139_v34 }
 0x3c6   :  { %1173 = vmatpush.msra.mxu1 %v1138_v18 }
 0x3c8   :  { %v1058_v33 = vpop.f32.mrf.mxu0 }
 0x3ce   :  { %v892_v21 = vpop.f32.mrf.mxu2 }
 0x3d6   :  { %v895_v24 = vpop.f32.mrf.mxu2 }
 0x3de   :  { %v898_v27 = vpop.f32.mrf.mxu2 }
 0x3e6   :  { %v901_v43 = vpop.f32.mrf.mxu2 }
 0x3ee   :  { %v904_v13 = vpop.f32.mrf.mxu2 }
 0x3f6   :  { %v907_v31 = vpop.f32.mrf.mxu2 }
 0x3fe   :  { %v910_v16 = vpop.f32.mrf.mxu2 }
 0x406   :  { %v913_v42 = vpop.f32.mrf.mxu2 }
 0x40e   :  { %v916_v63 = vpop.f32.mrf.mxu2 }
 0x416   :  { %v919_v9 = vpop.f32.mrf.mxu2 }
 0x41e   :  { %v922_v26 = vpop.f32.mrf.mxu2 }
 0x426   :  { %v925_v60 = vpop.f32.mrf.mxu2 }
 0x42e   :  { %v928_v32 = vpop.f32.mrf.mxu2 }
 0x436   :  { %v931_v29 = vpop.f32.mrf.mxu2 }
 0x43e   :  { %v934_v30 = vpop.f32.mrf.mxu2 }
 0x446   :  { %v937_v19 = vpop.f32.mrf.mxu2 }
 0x447   :  { %960 = vmatpush.msra.mxu3 %v937_v19 }
 0x449   :  { %961 = vmatpush.msra.mxu3 %v934_v30 }
 0x44b   :  { %962 = vmatpush.msra.mxu3 %v931_v29 }
 0x44d   :  { %963 = vmatpush.msra.mxu3 %v928_v32 }
 0x44f   :  { %964 = vmatpush.msra.mxu3 %v925_v60 }
 0x451   :  { %965 = vmatpush.msra.mxu3 %v922_v26 }
 0x453   :  { %966 = vmatpush.msra.mxu3 %v919_v9 }
 0x455   :  { %967 = vmatpush.msra.mxu3 %v916_v63 }
 0x457   :  { %968 = vmatpush.msra.mxu3 %v913_v42 }
 0x459   :  { %969 = vmatpush.msra.mxu3 %v910_v16 }
 0x45b   :  { %970 = vmatpush.msra.mxu3 %v907_v31 }
 0x45d   :  { %971 = vmatpush.msra.mxu3 %v904_v13 }
 0x45f   :  { %972 = vmatpush.msra.mxu3 %v901_v43  ;;  %v1425_v43 = vld [vmem:[%s2168_s10] ss:$0 sm:$0xff] }
 0x460   :  { %v944_v13 = vmul.f32 %v1425_v43, %v1975_v41  ;;  %v945_v9 = vmul.f32 %v1425_v43, %v1983_v52  ;;  %v946_v19 = vmul.f32 %v1425_v43, %v1987_v56  ;;  %v949_v5 = vmul.f32 %v1425_v43, %v2013_v10 }
 0x461   :  { %973 = vmatpush.msra.mxu3 %v898_v27  ;;  %v950_v0 = vmul.f32 %v1425_v43, %v1985_v55  ;;  %v951_v20 = vmul.f32 %v1425_v43, %v2000_v62 }
 0x463   :  { %974 = vmatpush.msra.mxu3 %v895_v24  ;;  %v1424_v24 = vld [vmem:[#allocation2 + $0x78] sm:$0xff] }
 0x465   :  { %975 = vmatpush.msra.mxu3 %v892_v21  ;;  %v1061_v21 = vpop.f32.mrf.mxu0 }
 0x466   :  { %976 = vmatmul.f32.vlgmr.msra.gmra.mxu3 %v1409_v47 }
 0x46d   :  { %v1064_v27 = vpop.f32.mrf.mxu0 }
 0x46e   :  { %979 = vmatmul.f32.gmra.mxu3 %v1410_v49 }
 0x475   :  { %v1067_v42 = vpop.f32.mrf.mxu0 }
 0x476   :  { %982 = vmatmul.f32.gmra.mxu3 %v1411_v57 }
 0x47d   :  { %v1070_v30 = vpop.f32.mrf.mxu0 }
 0x47e   :  { %985 = vmatmul.f32.gmra.mxu3 %v1412_v51 }
 0x485   :  { %v1073_v51 = vpop.f32.mrf.mxu0 }
 0x486   :  { %988 = vmatmul.f32.gmra.mxu3 %v1413_v37  ;;  %v947_v37 = vmul.f32 %v1425_v43, %v1991_v58 }
 0x48e   :  { %991 = vmatmul.f32.gmra.mxu3 %v1414_v53 }
 0x496   :  { %994 = vmatmul.f32.gmra.mxu3 %v1415_v40 }
 0x49e   :  { %997 = vmatmul.f32.gmra.mxu3 %v1416_v2 }
 0x4a6   :  { %1000 = vmatmul.f32.gmra.mxu3 %v1417_v17  ;;  %v948_v17 = vmul.f32 %v1425_v43, %v1998_v61 }
 0x4ae   :  { %1003 = vmatmul.f32.gmra.mxu3 %v1418_v22  ;;  %v1076_v22 = vpop.f32.mrf.mxu0 }
 0x4b6   :  { %1006 = vmatmul.f32.gmra.mxu3 %v1419_v39  ;;  %v1079_v58 = vpop.f32.mrf.mxu0 }
 0x4be   :  { %1009 = vmatmul.f32.gmra.mxu3 %v1420_v11 }
 0x4c6   :  { %1012 = vmatmul.f32.gmra.mxu3 %v1421_v14  ;;  %v1082_v14 = vpop.f32.mrf.mxu0 }
 0x4ce   :  { %1015 = vmatmul.f32.gmra.mxu3 %v1422_v28  ;;  %v1085_v28 = vpop.f32.mrf.mxu0 }
 0x4d6   :  { %1018 = vmatmul.f32.gmra.mxu3 %v1423_v45  ;;  %v1088_v45 = vpop.f32.mrf.mxu0 }
 0x4de   :  { %1021 = vmatmul.f32.gmra.mxu3 %v1424_v24 }
 0x4e9   :  { %v977_v31 = vpop.f32.mrf.mxu3 }
 0x4ea   :  { %v978_v16 = vadd.f32 %v977_v31, %v944_v13  ;;  %v1091_v31 = vpop.f32.mrf.mxu0 }
 0x4ec   :  { %v1106_v63 = vadd.f32 %v1058_v33, %v978_v16 }
 0x4ee   :  { %1377 = vtanh.f32 %v1106_v63 }
 0x4f1   :  { %v980_v26 = vpop.f32.mrf.mxu3 }
 0x4f2   :  { %v981_v60 = vadd.f32 %v980_v26, %v945_v9 }
 0x4f4   :  { %v1378_v32 = vpop.eup %1377  ;;  %v1107_v29 = vadd.f32 %v1061_v21, %v981_v60  ;;  %v1094_v60 = vpop.f32.mrf.mxu0 }
 0x4f5   :  { %1174 = vmatmul.f32.vlgmr.msra.gmra.mxu1 %v1378_v32 }
 0x4f6   :  { %1379 = vtanh.f32 %v1107_v29 }
 0x4f9   :  { %v983_v47 = vpop.f32.mrf.mxu3 }
 0x4fa   :  { %v984_v49 = vadd.f32 %v983_v47, %v946_v19 }
 0x4fc   :  { %v1380_v57 = vpop.eup %1379  ;;  %v1108_v41 = vadd.f32 %v1064_v27, %v984_v49 }
 0x4fd   :  { %1177 = vmatmul.f32.gmra.mxu1 %v1380_v57 }
 0x4fe   :  { %1381 = vtanh.f32 %v1108_v41 }
 0x501   :  { %v986_v53 = vpop.f32.mrf.mxu3 }
 0x502   :  { %v987_v52 = vadd.f32 %v986_v53, %v947_v37 }
 0x504   :  { %v1382_v40 = vpop.eup %1381  ;;  %v1109_v2 = vadd.f32 %v1067_v42, %v987_v52 }
 0x505   :  { %1180 = vmatmul.f32.gmra.mxu1 %v1382_v40 }
 0x506   :  { %1383 = vtanh.f32 %v1109_v2 }
 0x509   :  { %v989_v4 = vpop.f32.mrf.mxu3 }
 0x50a   :  { %v990_v56 = vadd.f32 %v989_v4, %v948_v17 }
 0x50c   :  { %v1384_v39 = vpop.eup %1383  ;;  %v1110_v44 = vadd.f32 %v1070_v30, %v990_v56 }
 0x50d   :  { %1183 = vmatmul.f32.gmra.mxu1 %v1384_v39 }
 0x50e   :  { %1385 = vtanh.f32 %v1110_v44 }
 0x511   :  { %v992_v38 = vpop.f32.mrf.mxu3 }
 0x512   :  { %v993_v8 = vadd.f32 %v992_v38, %v949_v5 }
 0x514   :  { %v1386_v11 = vpop.eup %1385  ;;  %v1111_v54 = vadd.f32 %v1073_v51, %v993_v8 }
 0x515   :  { %1186 = vmatmul.f32.gmra.mxu1 %v1386_v11 }
 0x516   :  { %1387 = vtanh.f32 %v1111_v54 }
 0x519   :  { %v995_v59 = vpop.f32.mrf.mxu3 }
 0x51a   :  { %v996_v61 = vadd.f32 %v995_v59, %v950_v0 }
 0x51c   :  { %v1388_v25 = vpop.eup %1387  ;;  %v1112_v1 = vadd.f32 %v1076_v22, %v996_v61  ;;  %v1312_v22 = vld [vmem:[%s2171_s13] ss:$0 sm:$0xff]  ;;  %s1665_s13 = smov [#allocation16]  }
 0x51d   :  { %1189 = vmatmul.f32.gmra.mxu1 %v1388_v25  ;;  %s1243_s16 = sshll.u32 %s1665_s13, 4  ;;  %s1244_s16 = int_to_ptr.vmem [resolvable:$true] %s1243_s16 }
 0x51e   :  { %1389 = vtanh.f32 %v1112_v1 }
 0x521   :  { %v998_v12 = vpop.f32.mrf.mxu3 }
 0x522   :  { %v999_v10 = vadd.f32 %v998_v12, %v951_v20 }
 0x524   :  { %v1390_v33 = vpop.eup %1389  ;;  %v1113_v23 = vadd.f32 %v1079_v58, %v999_v10 }
 0x525   :  { %1192 = vmatmul.f32.gmra.mxu1 %v1390_v33 }
 0x526   :  { %1391 = vtanh.f32 %v1113_v23 }
 0x529   :  { %v1001_v15 = vpop.f32.mrf.mxu3 }
 0x52a   :  { %v1002_v34 = vadd.f32 %v1001_v15, %v2042_v48 }
 0x52c   :  { %v1392_v55 = vpop.eup %1391  ;;  %v1114_v18 = vadd.f32 %v1082_v14, %v1002_v34 }
 0x52d   :  { %1195 = vmatmul.f32.gmra.mxu1 %v1392_v55 }
 0x52e   :  { %1393 = vtanh.f32 %v1114_v18 }
 0x531   :  { %v1004_v21 = vpop.f32.mrf.mxu3 }
 0x532   :  { %v1005_v24 = vadd.f32 %v1004_v21, %v2008_v6 }
 0x534   :  { %v1394_v27 = vpop.eup %1393  ;;  %v1115_v62 = vadd.f32 %v1085_v28, %v1005_v24 }
 0x535   :  { %1198 = vmatmul.f32.gmra.mxu1 %v1394_v27 }
 0x536   :  { %1395 = vtanh.f32 %v1115_v62 }
 0x539   :  { %v1007_v43 = vpop.f32.mrf.mxu3 }
 0x53a   :  { %v1008_v13 = vadd.f32 %v1007_v43, %v2025_v36  ;;  %v1097_v36 = vpop.f32.mrf.mxu0 }
 0x53c   :  { %v1396_v16 = vpop.eup %1395  ;;  %v1116_v42 = vadd.f32 %v1088_v45, %v1008_v13 }
 0x53d   :  { %1201 = vmatmul.f32.gmra.mxu1 %v1396_v16 }
 0x53e   :  { %1397 = vtanh.f32 %v1116_v42 }
 0x541   :  { %v1010_v48 = vpop.f32.mrf.mxu3 }
 0x542   :  { %v1011_v63 = vadd.f32 %v1010_v48, %v2045_v50  ;;  %v1100_v50 = vpop.f32.mrf.mxu0 }
 0x544   :  { %v1398_v9 = vpop.eup %1397  ;;  %v1117_v26 = vadd.f32 %v1091_v31, %v1011_v63 }
 0x545   :  { %1204 = vmatmul.f32.gmra.mxu1 %v1398_v9 }
 0x546   :  { %1399 = vtanh.f32 %v1117_v26 }
 0x549   :  { %v1013_v6 = vpop.f32.mrf.mxu3 }
 0x54a   :  { %v1014_v32 = vadd.f32 %v1013_v6, %v2011_v7  ;;  %v1103_v40 = vpop.f32.mrf.mxu0 }
 0x54c   :  { %v1400_v29 = vpop.eup %1399  ;;  %v1118_v30 = vadd.f32 %v1094_v60, %v1014_v32 }
 0x54d   :  { %1207 = vmatmul.f32.gmra.mxu1 %v1400_v29 }
 0x54e   :  { %1401 = vtanh.f32 %v1118_v30 }
 0x551   :  { %v1016_v19 = vpop.f32.mrf.mxu3 }
 0x552   :  { %v1017_v47 = vadd.f32 %v1016_v19, %v2022_v35 }
 0x554   :  { %v1402_v49 = vpop.eup %1401  ;;  %v1119_v57 = vadd.f32 %v1097_v36, %v1017_v47 }
 0x555   :  { %1210 = vmatmul.f32.gmra.mxu1 %v1402_v49 }
 0x556   :  { %1403 = vtanh.f32 %v1119_v57 }
 0x559   :  { %v1019_v41 = vpop.f32.mrf.mxu3 }
 0x55a   :  { %v1020_v51 = vadd.f32 %v1019_v41, %v2039_v46 }
 0x55c   :  { %v1404_v37 = vpop.eup %1403  ;;  %v1120_v53 = vadd.f32 %v1100_v50, %v1020_v51 }
 0x55d   :  { %1213 = vmatmul.f32.gmra.mxu1 %v1404_v37 }
 0x55e   :  { %1405 = vtanh.f32 %v1120_v53 }
 0x561   :  { %v1022_v7 = vpop.f32.mrf.mxu3 }
 0x562   :  { %v1023_v52 = vadd.f32 %v1022_v7, %v2005_v3 }
 0x564   :  { %v1406_v2 = vpop.eup %1405  ;;  %v1121_v17 = vadd.f32 %v1103_v40, %v1023_v52 }
 0x565   :  { %1216 = vmatmul.f32.gmra.mxu1 %v1406_v2 }
 0x566   :  { %1407 = vtanh.f32 %v1121_v17 }
 0x56c   :  { %v1408_v35 = vpop.eup %1407 }
 0x56d   :  { %1219 = vmatmul.f32.gmra.mxu1 %v1408_v35 }
 0x572   :  { %v1175_v4 = vpop.f32.mrf.mxu1 }
 0x573   :  { %v1176_v46 = vadd.f32 %v1312_v22, %v1175_v4 }
 0x575   :  { %1223 = vst [vmem:[#allocation16] sm:$0xff] %v1176_v46 }
 0x57a   :  { %v1178_v56 = vpop.f32.mrf.mxu1 }
 0x57b   :  { %v1179_v39 = vadd.f32 %v1312_v22, %v1178_v56 }
 0x57d   :  { %1224 = vst [vmem:[#allocation16 + $0x8] sm:$0xff] %v1179_v39 }
 0x582   :  { %v1181_v44 = vpop.f32.mrf.mxu1 }
 0x583   :  { %v1182_v5 = vadd.f32 %v1312_v22, %v1181_v44 }
 0x585   :  { %1225 = vst [vmem:[#allocation16 + $0x10] sm:$0xff] %v1182_v5 }
 0x58a   :  { %v1184_v3 = vpop.f32.mrf.mxu1 }
 0x58b   :  { %v1185_v38 = vadd.f32 %v1312_v22, %v1184_v3 }
 0x58d   :  { %1226 = vst [vmem:[#allocation16 + $0x18] sm:$0xff] %v1185_v38 }
 0x592   :  { %v1187_v8 = vpop.f32.mrf.mxu1 }
 0x593   :  { %v1188_v58 = vadd.f32 %v1312_v22, %v1187_v8 }
 0x595   :  { %1227 = vst [vmem:[#allocation16 + $0x20] sm:$0xff] %v1188_v58 }
 0x59a   :  { %v1190_v11 = vpop.f32.mrf.mxu1 }
 0x59b   :  { %v1191_v54 = vadd.f32 %v1312_v22, %v1190_v11 }
 0x59d   :  { %1228 = vst [vmem:[#allocation16 + $0x28] sm:$0xff] %v1191_v54 }
 0x5a2   :  { %v1193_v0 = vpop.f32.mrf.mxu1 }
 0x5a3   :  { %v1194_v59 = vadd.f32 %v1312_v22, %v1193_v0 }
 0x5a5   :  { %1229 = vst [vmem:[#allocation16 + $0x30] sm:$0xff] %v1194_v59 }
 0x5aa   :  { %v1196_v61 = vpop.f32.mrf.mxu1 }
 0x5ab   :  { %v1197_v25 = vadd.f32 %v1312_v22, %v1196_v61 }
 0x5ad   :  { %1230 = vst [vmem:[#allocation16 + $0x38] sm:$0xff] %v1197_v25 }
 0x5b2   :  { %v1199_v1 = vpop.f32.mrf.mxu1 }
 0x5b3   :  { %v1200_v14 = vadd.f32 %v1312_v22, %v1199_v1 }
 0x5b5   :  { %1231 = vst [vmem:[#allocation16 + $0x40] sm:$0xff] %v1200_v14 }
 0x5ba   :  { %v1202_v20 = vpop.f32.mrf.mxu1 }
 0x5bb   :  { %v1203_v12 = vadd.f32 %v1312_v22, %v1202_v20 }
 0x5bd   :  { %1232 = vst [vmem:[#allocation16 + $0x48] sm:$0xff] %v1203_v12 }
 0x5c2   :  { %v1205_v10 = vpop.f32.mrf.mxu1 }
 0x5c3   :  { %v1206_v33 = vadd.f32 %v1312_v22, %v1205_v10 }
 0x5c5   :  { %1233 = vst [vmem:[#allocation16 + $0x50] sm:$0xff] %v1206_v33 }
 0x5ca   :  { %v1208_v23 = vpop.f32.mrf.mxu1 }
 0x5cb   :  { %v1209_v28 = vadd.f32 %v1312_v22, %v1208_v23 }
 0x5cd   :  { %1234 = vst [vmem:[#allocation16 + $0x58] sm:$0xff] %v1209_v28 }
 0x5d2   :  { %v1211_v15 = vpop.f32.mrf.mxu1 }
 0x5d3   :  { %v1212_v34 = vadd.f32 %v1312_v22, %v1211_v15 }
 0x5d5   :  { %1235 = vst [vmem:[#allocation16 + $0x60] sm:$0xff] %v1212_v34 }
 0x5da   :  { %v1214_v55 = vpop.f32.mrf.mxu1 }
 0x5db   :  { %v1215_v18 = vadd.f32 %v1312_v22, %v1214_v55 }
 0x5dd   :  { %1236 = vst [vmem:[#allocation16 + $0x68] sm:$0xff] %v1215_v18 }
 0x5e2   :  { %v1217_v45 = vpop.f32.mrf.mxu1 }
 0x5e3   :  { %v1218_v21 = vadd.f32 %v1312_v22, %v1217_v45 }
 0x5e5   :  { %1237 = vst [vmem:[#allocation16 + $0x70] sm:$0xff] %v1218_v21 }
 0x5ea   :  { %v1220_v24 = vpop.f32.mrf.mxu1 }
 0x5eb   :  { %v1221_v27 = vadd.f32 %v1312_v22, %v1220_v24 }
 0x5ed   :  { %1238 = vst [vmem:[#allocation16 + $0x78] sm:$0xff] %v1221_v27 }
 0x5ee   :  { %1251 = dma.vmem_to_hbm [thread:$0]  %s1244_s16, 2048, %s1246_s1, [#allocation4], %s1655_s21, %s1655_s21, %s1656_s22  }
 0x5ef   :  { %1652 = dma.done.wait [#allocation4], 2048  }
 0x5f0   :  { %1653 = vsyncadd [#allocation4], 4294965248 }
 0x5f1   :  { %1256 = vsyncpa [#allocation3], 1 }
 0x5f2   :  { %1257 = vsyncpa [#allocation6], 1 }
 0x5f3   :  { %1258 = vsyncpa [#allocation9], 1 }
 0x5f4   :  { %1259 = vsyncpa [#allocation12], 1 }
 0x5f5   :  { %1260 = vsyncpa [#allocation15], 1 }
 0x5f6   :  { %1261 = vsyncpa [#allocation4], 1 }

</bundles_post_ra>
